<compile_context>
chip_gen: v6e
topology: v6e:2x2x1
jax: 0.10.0
libtpu: 0.0.40
codegen_flags: <defaults>
</compile_context>

<pallas_src>
import math
import functools

import numpy as np
import jax
import jax.numpy as jnp
from jax.experimental import pallas as pl
from jax.experimental.pallas import tpu as pltpu


_VMEM_LIMIT = 32 * 1024 * 1024  # explicit scoped-VMEM limit, safe on v5e/v6e/v7x


# ----------------------------- tiling helpers -----------------------------

def _pick_tile(dim, target, align):
    """Largest tile <= target that is a multiple of `align` and divides `dim`;
    falls back to the full dimension (always legal for BlockSpec)."""
    if dim <= target:
        return dim
    t = (target // align) * align
    while t >= align:
        if dim % t == 0:
            return t
        t -= align
    return dim


# ----------------------------- Pallas kernels -----------------------------

def _linear_kernel(x_ref, w_ref, b_ref, o_ref, acc_ref, *, activation):
    """y = x @ w + b (optional fused GELU). K axis is the innermost grid axis."""
    @pl.when(pl.program_id(2) == 0)
    def _():
        acc_ref[...] = jnp.zeros_like(acc_ref)

    acc_ref[...] += jnp.dot(x_ref[...], w_ref[...],
                            preferred_element_type=jnp.float32)

    @pl.when(pl.program_id(2) == pl.num_programs(2) - 1)
    def _():
        y = acc_ref[...] + b_ref[...]
        if activation == "gelu":
            # TODO(synk): erf-GELU replaced by tanh-approx GELU (Mosaic-safe transcendentals).
            c = jnp.float32(0.7978845608028654)  # sqrt(2/pi)
            y = 0.5 * y * (1.0 + jnp.tanh(c * (y + 0.044715 * y * y * y)))
        o_ref[...] = y.astype(o_ref.dtype)


def linear_bias(x, w, b, activation=None, tm=512, tn=512, tk=512):
    """Tiled, pipelined dense layer: (M,K)@(K,N)+b, bf16 in / bf16 out, f32 acc."""
    M, K = x.shape
    K2, N = w.shape
    assert K == K2
    x = x.astype(w.dtype)
    tm = _pick_tile(M, tm, 8)
    tn = _pick_tile(N, tn, 128)
    tk = _pick_tile(K, tk, 128)
    grid = (M // tm, N // tn, K // tk)
    flops = 2 * M * N * K
    transcendentals = M * N if activation == "gelu" else 0
    bytes_accessed = (M * K + M * N + K * N) * 2 + N * 4
    return pl.pallas_call(
        functools.partial(_linear_kernel, activation=activation),
        out_shape=jax.ShapeDtypeStruct((M, N), jnp.bfloat16),
        grid_spec=pltpu.PrefetchScalarGridSpec(
            num_scalar_prefetch=0,
            grid=grid,
            in_specs=[
                pl.BlockSpec((tm, tk), lambda i, j, k: (i, k)),
                pl.BlockSpec((tk, tn), lambda i, j, k: (k, j)),
                pl.BlockSpec((1, tn), lambda i, j, k: (0, j)),
            ],
            out_specs=pl.BlockSpec((tm, tn), lambda i, j, k: (i, j)),
            scratch_shapes=[pltpu.VMEM((tm, tn), jnp.float32)],
        ),
        compiler_params=pltpu.CompilerParams(
            dimension_semantics=("parallel", "parallel", "arbitrary"),
            vmem_limit_bytes=_VMEM_LIMIT),
        cost_estimate=pl.CostEstimate(flops=flops,
                                      transcendentals=transcendentals,
                                      bytes_accessed=bytes_accessed),
    )(x, w, b.reshape(1, N).astype(jnp.float32))


def _linear_res_ln_kernel(x_ref, w_ref, b_ref, res_ref, g_ref, beta_ref,
                          o_ref, acc_ref, *, eps):
    """y = LayerNorm(x @ w + b + residual); N (=H) is kept whole on lanes."""
    @pl.when(pl.program_id(1) == 0)
    def _():
        acc_ref[...] = jnp.zeros_like(acc_ref)

    acc_ref[...] += jnp.dot(x_ref[...], w_ref[...],
                            preferred_element_type=jnp.float32)

    @pl.when(pl.program_id(1) == pl.num_programs(1) - 1)
    def _():
        y = acc_ref[...] + b_ref[...] + res_ref[...].astype(jnp.float32)
        mu = jnp.mean(y, axis=-1, keepdims=True)
        var = jnp.mean(jnp.square(y - mu), axis=-1, keepdims=True)
        out = (y - mu) * jax.lax.rsqrt(var + eps) * g_ref[...] + beta_ref[...]
        o_ref[...] = out.astype(o_ref.dtype)


def linear_residual_layernorm(x, w, b, residual, gamma, beta,
                              eps=1e-12, tm=512, tk=512):
    """Tiled dense layer with fused bias + residual add + LayerNorm epilogue."""
    M, K = x.shape
    _, N = w.shape
    x = x.astype(w.dtype)
    tm = _pick_tile(M, tm, 8)
    tk = _pick_tile(K, tk, 128)
    grid = (M // tm, K // tk)
    flops = 2 * M * N * K + 5 * M * N
    bytes_accessed = (M * K + 2 * M * N + K * N) * 2 + 3 * N * 4
    return pl.pallas_call(
        functools.partial(_linear_res_ln_kernel, eps=eps),
        out_shape=jax.ShapeDtypeStruct((M, N), jnp.bfloat16),
        grid_spec=pltpu.PrefetchScalarGridSpec(
            num_scalar_prefetch=0,
            grid=grid,
            in_specs=[
                pl.BlockSpec((tm, tk), lambda i, k: (i, k)),
                pl.BlockSpec((tk, N), lambda i, k: (k, 0)),
                pl.BlockSpec((1, N), lambda i, k: (0, 0)),
                pl.BlockSpec((tm, N), lambda i, k: (i, 0)),
                pl.BlockSpec((1, N), lambda i, k: (0, 0)),
                pl.BlockSpec((1, N), lambda i, k: (0, 0)),
            ],
            out_specs=pl.BlockSpec((tm, N), lambda i, k: (i, 0)),
            scratch_shapes=[pltpu.VMEM((tm, N), jnp.float32)],
        ),
        compiler_params=pltpu.CompilerParams(
            dimension_semantics=("parallel", "arbitrary"),
            vmem_limit_bytes=_VMEM_LIMIT),
        cost_estimate=pl.CostEstimate(flops=flops, transcendentals=M,
                                      bytes_accessed=bytes_accessed),
    )(x, w, b.reshape(1, N).astype(jnp.float32), residual,
      gamma.reshape(1, N).astype(jnp.float32),
      beta.reshape(1, N).astype(jnp.float32))


def _attn_kernel(q_ref, k_ref, v_ref, mask_ref, o_ref, *, scale, hpb, dh):
    """Per-(batch row, head block) attention, reading column slices of qkv."""
    m = mask_ref[0]                                      # (1, S) key mask (0/1)
    bias = (1.0 - m) * jnp.float32(-1e9)                 # additive bias, built in-kernel
    outs = []
    for hh in range(hpb):                                # unrolled; static lane slices
        q = q_ref[:, hh * dh:(hh + 1) * dh]              # (S, Dh) bf16
        k = k_ref[:, hh * dh:(hh + 1) * dh]
        v = v_ref[:, hh * dh:(hh + 1) * dh]
        s = jax.lax.dot_general(q, k, (((1,), (1,)), ((), ())),
                                preferred_element_type=jnp.float32)   # (S, S)
        s = s * scale + bias
        s = s - jnp.max(s, axis=-1, keepdims=True)
        p = jnp.exp(s)
        p = p * pl.reciprocal(jnp.sum(p, axis=-1, keepdims=True), approx=True)
        outs.append(jnp.dot(p.astype(jnp.bfloat16), v,
                            preferred_element_type=jnp.float32))      # (S, Dh)
    # single lane-dense (S, hpb*Dh) store
    o_ref[...] = jnp.concatenate(outs, axis=1).astype(o_ref.dtype)


def _pick_hpb(B, nh, S, dh, budget_bytes=2 * 1024 * 1024):
    """Heads per grid step: divides nh, keeps hpb*Dh lane-aligned, keeps the
    per-step (hpb,S,S) score footprint under budget, and leaves >=2 grid
    blocks when B==1 so both v7x TensorCores get work."""
    divisors = [h for h in range(nh, 0, -1) if nh % h == 0]
    aligned = [h for h in divisors if (h * dh) % 128 == 0]
    pool = aligned if aligned else divisors
    hpb = pool[-1]
    for h in pool:
        if h * S * S * 4 <= budget_bytes:
            hpb = h
            break
    if B == 1 and hpb == nh and nh > 1:
        smaller = [h for h in pool if h < nh]
        if smaller:
            hpb = smaller[0]
    return hpb


def attention(qkv, mask_b1s, nh, dh):
    """qkv: (B*S, 3H) bf16 (Q | K | V columns).  Returns ctx (B*S, H) bf16 in
    the standard head-interleaved layout, written directly (no XLA transpose)."""
    M, threeH = qkv.shape
    H = threeH // 3
    assert H == nh * dh
    B = mask_b1s.shape[0]
    S = M // B
    hpb = _pick_hpb(B, nh, S, dh)
    nb = nh // hpb
    bw = hpb * dh
    flops = 4 * B * nh * S * S * dh
    transcendentals = B * nh * S * S
    bytes_accessed = (3 * M * H + M * H) * 2 + B * S * 4
    kern = functools.partial(_attn_kernel, scale=1.0 / math.sqrt(dh),
                             hpb=hpb, dh=dh)
    return pl.pallas_call(
        kern,
        out_shape=jax.ShapeDtypeStruct((M, H), jnp.bfloat16),
        grid=(B, nb),
        in_specs=[
            pl.BlockSpec((S, bw), lambda b, h: (b, h)),           # Q columns
            pl.BlockSpec((S, bw), lambda b, h: (b, nb + h)),      # K columns (offset H)
            pl.BlockSpec((S, bw), lambda b, h: (b, 2 * nb + h)),  # V columns (offset 2H)
            pl.BlockSpec((1, 1, S), lambda b, h: (b, 0, 0)),
        ],
        out_specs=pl.BlockSpec((S, bw), lambda b, h: (b, h)),
        compiler_params=pltpu.CompilerParams(
            dimension_semantics=("parallel", "parallel"),
            vmem_limit_bytes=_VMEM_LIMIT),
        cost_estimate=pl.CostEstimate(flops=flops,
                                      transcendentals=transcendentals,
                                      bytes_accessed=bytes_accessed),
    )(qkv, qkv, qkv, mask_b1s)


def _idf_pool_kernel(h_ref, mw_ref, inv_ref, o_ref, *, rb):
    # h_ref: (rb, S, H) bf16; mw_ref: (rb, 1, S) f32; inv_ref: (rb, 1, 1) f32
    for r in range(rb):
        num = jnp.dot(mw_ref[r], h_ref[r].astype(jnp.float32),
                      preferred_element_type=jnp.float32)          # (1, H) on MXU
        o_ref[r] = num * inv_ref[r]


def masked_weighted_mean_pool(hidden, mask_f, weights):
    """out[b] = sum_s(h[b,s]*mask[b,s]*w[b,s]) / clamp(sum_s mask[b,s], 1e-9)."""
    B, S, H = hidden.shape
    rb = 1
    for cand in range(min(B, 8), 0, -1):      # batch rows per grid step
        if B % cand == 0:
            rb = cand
            break
    mw = (mask_f * weights).reshape(B, 1, S).astype(jnp.float32)
    inv = (1.0 / jnp.maximum(jnp.sum(mask_f, axis=-1), 1e-9)).reshape(B, 1, 1)
    out = pl.pallas_call(
        functools.partial(_idf_pool_kernel, rb=rb),
        out_shape=jax.ShapeDtypeStruct((B, 1, H), jnp.float32),
        grid=(B // rb,),
        in_specs=[
            pl.BlockSpec((rb, S, H), lambda i: (i, 0, 0)),
            pl.BlockSpec((rb, 1, S), lambda i: (i, 0, 0)),
            pl.BlockSpec((rb, 1, 1), lambda i: (i, 0, 0)),
        ],
        out_specs=pl.BlockSpec((rb, 1, H), lambda i: (i, 0, 0)),
        compiler_params=pltpu.CompilerParams(
            dimension_semantics=("parallel",),
            vmem_limit_bytes=_VMEM_LIMIT),
    )(hidden, mw, inv.astype(jnp.float32))
    return out.reshape(B, H)


# ----------------------------- plain-JAX glue -----------------------------

def layer_norm(x, gamma, beta, eps=1e-12):
    mu = jnp.mean(x, axis=-1, keepdims=True)
    var = jnp.mean((x - mu) ** 2, axis=-1, keepdims=True)
    return (x - mu) * jax.lax.rsqrt(var + eps) * gamma + beta


def init_bert_params(key, vocab, H, nh, inter, n_layers, max_pos):
    def nrm(k, shape, std=0.02):
        return std * jax.random.normal(k, shape, dtype=jnp.float32)

    keys = jax.random.split(key, 4 + 12 * n_layers)
    p = {
        "word_emb": nrm(keys[0], (vocab, H)),
        "pos_emb": nrm(keys[1], (max_pos, H)),
        "type_emb": nrm(keys[2], (2, H)),
        "emb_ln_g": jnp.ones((H,), jnp.float32),
        "emb_ln_b": jnp.zeros((H,), jnp.float32),
        "layers": [],
    }
    ki = 4
    for _ in range(n_layers):
        wq = nrm(keys[ki + 0], (H, H))
        wk = nrm(keys[ki + 1], (H, H))
        wv = nrm(keys[ki + 2], (H, H))
        lyr = {
            # fused QKV projection; weights stored bf16 (f32 MXU accumulation in-kernel)
            "wqkv": jnp.concatenate([wq, wk, wv], axis=1).astype(jnp.bfloat16),
            "bqkv": jnp.zeros((3 * H,), jnp.float32),
            "wo": nrm(keys[ki + 3], (H, H)).astype(jnp.bfloat16),
            "bo": jnp.zeros((H,), jnp.float32),
            "ln1_g": jnp.ones((H,), jnp.float32), "ln1_b": jnp.zeros((H,), jnp.float32),
            "w1": nrm(keys[ki + 4], (H, inter)).astype(jnp.bfloat16),
            "b1": jnp.zeros((inter,), jnp.float32),
            "w2": nrm(keys[ki + 5], (inter, H)).astype(jnp.bfloat16),
            "b2": jnp.zeros((H,), jnp.float32),
            "ln2_g": jnp.ones((H,), jnp.float32), "ln2_b": jnp.zeros((H,), jnp.float32),
        }
        ki += 12
        p["layers"].append(lyr)
    return p


def build_idf_table(idf_dict, vocab):
    """token_id -> log2(719/(1+df)), default log2(719).  Built once on host."""
    tbl = np.full((vocab,), math.log(719, 2), dtype=np.float32)
    for tok, df in idf_dict.items():
        if 0 <= tok < vocab:
            tbl[tok] = math.log(719 / (1 + df), 2)
    return jnp.asarray(tbl)


def bert_forward(params, ids, mask, nh):
    """Tiny BERT encoder; returns last hidden state (== `loss1` in the torch code)."""
    B, S = ids.shape
    H = params["word_emb"].shape[1]
    Dh = H // nh

    emb = (params["word_emb"][ids]
           + params["pos_emb"][:S][None, :, :]
           + params["type_emb"][0][None, None, :])        # token_type_ids=None -> 0
    x = layer_norm(emb, params["emb_ln_g"], params["emb_ln_b"])
    x = x.reshape(B * S, H).astype(jnp.bfloat16)           # bf16 activations from here

    mask_b1s = mask.astype(jnp.float32).reshape(B, 1, S)    # key mask, built once

    for lyr in params["layers"]:
        qkv = linear_bias(x, lyr["wqkv"], lyr["bqkv"])                     # (B*S, 3H)
        ctx = attention(qkv, mask_b1s, nh, Dh)                             # (B*S, H)
        # attention output projection + residual + LayerNorm, fused
        x = linear_residual_layernorm(ctx, lyr["wo"], lyr["bo"], x,
                                      lyr["ln1_g"], lyr["ln1_b"])
        # FFN: bias+GELU fused into first matmul; bias+residual+LN into second
        h = linear_bias(x, lyr["w1"], lyr["b1"], activation="gelu")        # (B*S, inter)
        x = linear_residual_layernorm(h, lyr["w2"], lyr["b2"], x,
                                      lyr["ln2_g"], lyr["ln2_b"])
    return x.reshape(B, S, H)


@functools.partial(jax.jit, static_argnames=("nh", "pooling"))
def sbert_forward(params, idf_table, in1, in1m, nh, pooling="idf"):
    hidden = bert_forward(params, in1, in1m, nh)           # loss1  (B,S,H) bf16
    mask_f = in1m.astype(jnp.float32)

    if pooling == "idf":
        w = idf_table[in1]                                 # device-side gather, jittable
        return masked_weighted_mean_pool(hidden, mask_f, w)
    if pooling == "avg":
        return masked_weighted_mean_pool(hidden, mask_f, jnp.ones_like(mask_f))
    if pooling == "cls":
        return hidden[:, 0, :].astype(jnp.float32)
    if pooling == "max":
        neg = jnp.where(mask_f[..., None] == 0.0, jnp.float32(-1e9),
                        hidden.astype(jnp.float32))
        return jnp.max(neg, axis=1)
    raise ValueError(pooling)


# --------------------------------- main ---------------------------------

if __name__ == "__main__":
    # H=128 keeps attention column blocks lane-aligned (hpb*Dh multiple of 128).
    B, S, H, NH, INTER, VOCAB, LAYERS, MAX_POS = 2, 8, 128, 2, 256, 128, 2, 16

    key = jax.random.PRNGKey(0)
    k_params, k_ids = jax.random.split(key)

    params = init_bert_params(k_params, VOCAB, H, NH, INTER, LAYERS, MAX_POS)

    # deterministic synthetic idf table (token_id -> document frequency)
    idf_dict = {t: (t % 7) + 1 for t in range(0, VOCAB, 3)}
    idf_table = build_idf_table(idf_dict, VOCAB)

    in1 = jax.random.randint(k_ids, (B, S), 0, VOCAB, dtype=jnp.int32)
    in1m = jnp.array([[1, 1, 1, 1, 1, 1, 1, 1],
                      [1, 1, 1, 1, 1, 0, 0, 0]], dtype=jnp.int32)

    out = sbert_forward(params, idf_table, in1, in1m, NH, pooling="idf")
    out = jax.block_until_ready(out)
    assert out.shape == (B, H) and out.dtype == jnp.float32
    assert bool(jnp.all(jnp.isfinite(out)))
    print("KERNEL_OK")
</pallas_src>

<mosaic_0001>
module attributes {stable_mosaic.version = 11 : i64} {
  func.func @_linear_kernel(%arg0: i32, %arg1: i32, %arg2: i32, %arg3: memref<16x128xbf16, #tpu.memory_space<vmem>>, %arg4: memref<128x384xbf16, #tpu.memory_space<vmem>>, %arg5: memref<1x384xf32, #tpu.memory_space<vmem>>, %arg6: memref<16x384xbf16, #tpu.memory_space<vmem>>, %arg7: memref<16x384xf32, #tpu.memory_space<vmem>>) attributes {dimension_semantics = [#tpu.dimension_semantics<parallel>, #tpu.dimension_semantics<parallel>, #tpu.dimension_semantics<arbitrary>], iteration_bounds = array<i64: 1, 1, 1>, scalar_prefetch = 0 : i64, scratch_operands = 1 : i64, tpu.core_type = #tpu.core_type<tc>, window_params = [{transform_indices = @transform_0, window_bounds = array<i64: 16, 128>}, {transform_indices = @transform_1, window_bounds = array<i64: 128, 384>}, {transform_indices = @transform_2, window_bounds = array<i64: 1, 384>}, {transform_indices = @transform_3, window_bounds = array<i64: 16, 384>}]} {
    %c0_i32 = arith.constant 0 : i32
    %0 = arith.cmpi eq, %arg2, %c0_i32 : i32
    %1 = arith.extui %0 : i1 to i32
    %c0_i32_0 = arith.constant 0 : i32
    %2 = arith.cmpi ne, %1, %c0_i32_0 : i32
    scf.if %2 {
      %cst_10 = arith.constant 0.000000e+00 : f32
      %12 = vector.broadcast %cst_10 : f32 to vector<16x384xf32>
      %c0_11 = arith.constant 0 : index
      %c0_12 = arith.constant 0 : index
      %13 = vector.load %arg7[%c0_11, %c0_12] : memref<16x384xf32, #tpu.memory_space<vmem>>, vector<16x384xf32>
      tpu.vector_store %arg7[%c0_11, %c0_12], %12 {strides = array<i32>} : memref<16x384xf32, #tpu.memory_space<vmem>>, vector<16x384xf32>,
    } else {
    }
    %c0 = arith.constant 0 : index
    %c0_1 = arith.constant 0 : index
    %3 = vector.load %arg7[%c0, %c0_1] : memref<16x384xf32, #tpu.memory_space<vmem>>, vector<16x384xf32>
    %c0_2 = arith.constant 0 : index
    %c0_3 = arith.constant 0 : index
    %4 = vector.load %arg3[%c0_2, %c0_3] : memref<16x128xbf16, #tpu.memory_space<vmem>>, vector<16x128xbf16>
    %c0_4 = arith.constant 0 : index
    %c0_5 = arith.constant 0 : index
    %5 = vector.load %arg4[%c0_4, %c0_5] : memref<128x384xbf16, #tpu.memory_space<vmem>>, vector<128x384xbf16>
    %cst = arith.constant dense<0.000000e+00> : vector<16x384xf32>
    %6 = tpu.matmul %4, %5, %cst {dimension_numbers = #tpu.dot_dimension_numbers<[1], [0], [0], [1], [0, 0, 1, 1], [], []>} : vector<16x128xbf16>, vector<128x384xbf16>, vector<16x384xf32> -> vector<16x384xf32>
    %7 = arith.addf %3, %6 : vector<16x384xf32>
    %c0_6 = arith.constant 0 : index
    %c0_7 = arith.constant 0 : index
    %8 = vector.load %arg7[%c0_6, %c0_7] : memref<16x384xf32, #tpu.memory_space<vmem>>, vector<16x384xf32>
    tpu.vector_store %arg7[%c0_6, %c0_7], %7 {strides = array<i32>} : memref<16x384xf32, #tpu.memory_space<vmem>>, vector<16x384xf32>,
    %c0_i32_8 = arith.constant 0 : i32
    %9 = arith.cmpi eq, %arg2, %c0_i32_8 : i32
    %10 = arith.extui %9 : i1 to i32
    %c0_i32_9 = arith.constant 0 : i32
    %11 = arith.cmpi ne, %10, %c0_i32_9 : i32
    scf.if %11 {
      %c0_10 = arith.constant 0 : index
      %c0_11 = arith.constant 0 : index
      %12 = vector.load %arg7[%c0_10, %c0_11] : memref<16x384xf32, #tpu.memory_space<vmem>>, vector<16x384xf32>
      %c0_12 = arith.constant 0 : index
      %c0_13 = arith.constant 0 : index
      %13 = vector.load %arg5[%c0_12, %c0_13] : memref<1x384xf32, #tpu.memory_space<vmem>>, vector<1x384xf32>
      %14 = vector.broadcast %13 : vector<1x384xf32> to vector<16x384xf32>
      %15 = arith.addf %12, %14 : vector<16x384xf32>
      %16 = arith.truncf %15 : vector<16x384xf32> to vector<16x384xbf16>
      %c0_14 = arith.constant 0 : index
      %c0_15 = arith.constant 0 : index
      %17 = vector.load %arg6[%c0_14, %c0_15] : memref<16x384xbf16, #tpu.memory_space<vmem>>, vector<16x384xbf16>
      tpu.vector_store %arg6[%c0_14, %c0_15], %16 {strides = array<i32>} : memref<16x384xbf16, #tpu.memory_space<vmem>>, vector<16x384xbf16>,
    } else {
    }
    return
  }
  func.func @transform_0(%arg0: i32, %arg1: i32, %arg2: i32) -> (i32, i32) {
    %c0_i32 = arith.constant 0 : i32
    return %arg0, %arg2 : i32, i32
  }
  func.func @transform_1(%arg0: i32, %arg1: i32, %arg2: i32) -> (i32, i32) {
    %c0_i32 = arith.constant 0 : i32
    return %arg2, %arg1 : i32, i32
  }
  func.func @transform_2(%arg0: i32, %arg1: i32, %arg2: i32) -> (i32, i32) {
    %c0_i32 = arith.constant 0 : i32
    %c0_i32_0 = arith.constant 0 : i32
    return %c0_i32, %arg1 : i32, i32
  }
  func.func @transform_3(%arg0: i32, %arg1: i32, %arg2: i32) -> (i32, i32) {
    %c0_i32 = arith.constant 0 : i32
    return %arg0, %arg1 : i32, i32
  }
}

module attributes {stable_mosaic.version = 11 : i64} {
  func.func @_linear_res_ln_kernel(%arg0: i32, %arg1: i32, %arg2: memref<16x128xbf16, #tpu.memory_space<vmem>>, %arg3: memref<128x128xbf16, #tpu.memory_space<vmem>>, %arg4: memref<1x128xf32, #tpu.memory_space<vmem>>, %arg5: memref<16x128xbf16, #tpu.memory_space<vmem>>, %arg6: memref<1x128xf32, #tpu.memory_space<vmem>>, %arg7: memref<1x128xf32, #tpu.memory_space<vmem>>, %arg8: memref<16x128xbf16, #tpu.memory_space<vmem>>, %arg9: memref<16x128xf32, #tpu.memory_space<vmem>>) attributes {dimension_semantics = [#tpu.dimension_semantics<parallel>, #tpu.dimension_semantics<arbitrary>], iteration_bounds = array<i64: 1, 1>, scalar_prefetch = 0 : i64, scratch_operands = 1 : i64, tpu.core_type = #tpu.core_type<tc>, window_params = [{transform_indices = @transform_0, window_bounds = array<i64: 16, 128>}, {transform_indices = @transform_1, window_bounds = array<i64: 128, 128>}, {pipeline_mode = #tpu.pipeline_mode<synchronous>, transform_indices = @transform_2, window_bounds = array<i64: 1, 128>}, {transform_indices = @transform_3, window_bounds = array<i64: 16, 128>}, {pipeline_mode = #tpu.pipeline_mode<synchronous>, transform_indices = @transform_4, window_bounds = array<i64: 1, 128>}, {pipeline_mode = #tpu.pipeline_mode<synchronous>, transform_indices = @transform_5, window_bounds = array<i64: 1, 128>}, {transform_indices = @transform_6, window_bounds = array<i64: 16, 128>}]} {
    %c0_i32 = arith.constant 0 : i32
    %0 = arith.cmpi eq, %arg1, %c0_i32 : i32
    %1 = arith.extui %0 : i1 to i32
    %c0_i32_0 = arith.constant 0 : i32
    %2 = arith.cmpi ne, %1, %c0_i32_0 : i32
    scf.if %2 {
      %cst_10 = arith.constant 0.000000e+00 : f32
      %12 = vector.broadcast %cst_10 : f32 to vector<16x128xf32>
      %c0_11 = arith.constant 0 : index
      %c0_12 = arith.constant 0 : index
      %13 = vector.load %arg9[%c0_11, %c0_12] : memref<16x128xf32, #tpu.memory_space<vmem>>, vector<16x128xf32>
      tpu.vector_store %arg9[%c0_11, %c0_12], %12 {strides = array<i32>} : memref<16x128xf32, #tpu.memory_space<vmem>>, vector<16x128xf32>,
    } else {
    }
    %c0 = arith.constant 0 : index
    %c0_1 = arith.constant 0 : index
    %3 = vector.load %arg9[%c0, %c0_1] : memref<16x128xf32, #tpu.memory_space<vmem>>, vector<16x128xf32>
    %c0_2 = arith.constant 0 : index
    %c0_3 = arith.constant 0 : index
    %4 = vector.load %arg2[%c0_2, %c0_3] : memref<16x128xbf16, #tpu.memory_space<vmem>>, vector<16x128xbf16>
    %c0_4 = arith.constant 0 : index
    %c0_5 = arith.constant 0 : index
    %5 = vector.load %arg3[%c0_4, %c0_5] : memref<128x128xbf16, #tpu.memory_space<vmem>>, vector<128x128xbf16>
    %cst = arith.constant dense<0.000000e+00> : vector<16x128xf32>
    %6 = tpu.matmul %4, %5, %cst {dimension_numbers = #tpu.dot_dimension_numbers<[1], [0], [0], [1], [0, 0, 1, 1], [], []>} : vector<16x128xbf16>, vector<128x128xbf16>, vector<16x128xf32> -> vector<16x128xf32>
    %7 = arith.addf %3, %6 : vector<16x128xf32>
    %c0_6 = arith.constant 0 : index
    %c0_7 = arith.constant 0 : index
    %8 = vector.load %arg9[%c0_6, %c0_7] : memref<16x128xf32, #tpu.memory_space<vmem>>, vector<16x128xf32>
    tpu.vector_store %arg9[%c0_6, %c0_7], %7 {strides = array<i32>} : memref<16x128xf32, #tpu.memory_space<vmem>>, vector<16x128xf32>,
    %c0_i32_8 = arith.constant 0 : i32
    %9 = arith.cmpi eq, %arg1, %c0_i32_8 : i32
    %10 = arith.extui %9 : i1 to i32
    %c0_i32_9 = arith.constant 0 : i32
    %11 = arith.cmpi ne, %10, %c0_i32_9 : i32
    scf.if %11 {
      %c0_10 = arith.constant 0 : index
      %c0_11 = arith.constant 0 : index
      %12 = vector.load %arg9[%c0_10, %c0_11] : memref<16x128xf32, #tpu.memory_space<vmem>>, vector<16x128xf32>
      %c0_12 = arith.constant 0 : index
      %c0_13 = arith.constant 0 : index
      %13 = vector.load %arg4[%c0_12, %c0_13] : memref<1x128xf32, #tpu.memory_space<vmem>>, vector<1x128xf32>
      %14 = vector.broadcast %13 : vector<1x128xf32> to vector<16x128xf32>
      %15 = arith.addf %12, %14 : vector<16x128xf32>
      %c0_14 = arith.constant 0 : index
      %c0_15 = arith.constant 0 : index
      %16 = vector.load %arg5[%c0_14, %c0_15] : memref<16x128xbf16, #tpu.memory_space<vmem>>, vector<16x128xbf16>
      %17 = arith.extf %16 : vector<16x128xbf16> to vector<16x128xf32>
      %18 = arith.addf %15, %17 : vector<16x128xf32>
      %cst_16 = arith.constant dense<0.000000e+00> : vector<16xf32>
      %19 = vector.multi_reduction <add>, %18, %cst_16 [1] : vector<16x128xf32> to vector<16xf32>
      %20 = vector.shape_cast %19 : vector<16xf32> to vector<16x1xf32>
      %cst_17 = arith.constant 1.280000e+02 : f32
      %21 = vector.broadcast %cst_17 : f32 to vector<16x1xf32>
      %22 = arith.divf %20, %21 : vector<16x1xf32>
      %23 = vector.broadcast %22 : vector<16x1xf32> to vector<16x128xf32>
      %24 = arith.subf %18, %23 : vector<16x128xf32>
      %25 = arith.mulf %24, %24 : vector<16x128xf32>
      %cst_18 = arith.constant dense<0.000000e+00> : vector<16xf32>
      %26 = vector.multi_reduction <add>, %25, %cst_18 [1] : vector<16x128xf32> to vector<16xf32>
      %27 = vector.shape_cast %26 : vector<16xf32> to vector<16x1xf32>
      %cst_19 = arith.constant 1.280000e+02 : f32
      %28 = vector.broadcast %cst_19 : f32 to vector<16x1xf32>
      %29 = arith.divf %27, %28 : vector<16x1xf32>
      %30 = vector.broadcast %22 : vector<16x1xf32> to vector<16x128xf32>
      %31 = arith.subf %18, %30 : vector<16x128xf32>
      %cst_20 = arith.constant 9.99999996E-13 : f32
      %32 = vector.broadcast %cst_20 : f32 to vector<16x1xf32>
      %33 = arith.addf %29, %32 : vector<16x1xf32>
      %34 = math.rsqrt %33 : vector<16x1xf32>
      %35 = vector.broadcast %34 : vector<16x1xf32> to vector<16x128xf32>
      %36 = arith.mulf %31, %35 : vector<16x128xf32>
      %c0_21 = arith.constant 0 : index
      %c0_22 = arith.constant 0 : index
      %37 = vector.load %arg6[%c0_21, %c0_22] : memref<1x128xf32, #tpu.memory_space<vmem>>, vector<1x128xf32>
      %38 = vector.broadcast %37 : vector<1x128xf32> to vector<16x128xf32>
      %39 = arith.mulf %36, %38 : vector<16x128xf32>
      %c0_23 = arith.constant 0 : index
      %c0_24 = arith.constant 0 : index
      %40 = vector.load %arg7[%c0_23, %c0_24] : memref<1x128xf32, #tpu.memory_space<vmem>>, vector<1x128xf32>
      %41 = vector.broadcast %40 : vector<1x128xf32> to vector<16x128xf32>
      %42 = arith.addf %39, %41 : vector<16x128xf32>
      %43 = arith.truncf %42 : vector<16x128xf32> to vector<16x128xbf16>
      %c0_25 = arith.constant 0 : index
      %c0_26 = arith.constant 0 : index
      %44 = vector.load %arg8[%c0_25, %c0_26] : memref<16x128xbf16, #tpu.memory_space<vmem>>, vector<16x128xbf16>
      tpu.vector_store %arg8[%c0_25, %c0_26], %43 {strides = array<i32>} : memref<16x128xbf16, #tpu.memory_space<vmem>>, vector<16x128xbf16>,
    } else {
    }
    return
  }
  func.func @transform_0(%arg0: i32, %arg1: i32) -> (i32, i32) {
    %c0_i32 = arith.constant 0 : i32
    return %arg0, %arg1 : i32, i32
  }
  func.func @transform_1(%arg0: i32, %arg1: i32) -> (i32, i32) {
    %c0_i32 = arith.constant 0 : i32
    %c0_i32_0 = arith.constant 0 : i32
    return %arg1, %c0_i32 : i32, i32
  }
  func.func @transform_2(%arg0: i32, %arg1: i32) -> (i32, i32) {
    %c0_i32 = arith.constant 0 : i32
    %c0_i32_0 = arith.constant 0 : i32
    %c0_i32_1 = arith.constant 0 : i32
    return %c0_i32, %c0_i32_0 : i32, i32
  }
  func.func @transform_3(%arg0: i32, %arg1: i32) -> (i32, i32) {
    %c0_i32 = arith.constant 0 : i32
    %c0_i32_0 = arith.constant 0 : i32
    return %arg0, %c0_i32 : i32, i32
  }
  func.func @transform_4(%arg0: i32, %arg1: i32) -> (i32, i32) {
    %c0_i32 = arith.constant 0 : i32
    %c0_i32_0 = arith.constant 0 : i32
    %c0_i32_1 = arith.constant 0 : i32
    return %c0_i32, %c0_i32_0 : i32, i32
  }
  func.func @transform_5(%arg0: i32, %arg1: i32) -> (i32, i32) {
    %c0_i32 = arith.constant 0 : i32
    %c0_i32_0 = arith.constant 0 : i32
    %c0_i32_1 = arith.constant 0 : i32
    return %c0_i32, %c0_i32_0 : i32, i32
  }
  func.func @transform_6(%arg0: i32, %arg1: i32) -> (i32, i32) {
    %c0_i32 = arith.constant 0 : i32
    %c0_i32_0 = arith.constant 0 : i32
    return %arg0, %c0_i32 : i32, i32
  }
}

module attributes {stable_mosaic.version = 11 : i64} {
  func.func @_attn_kernel(%arg0: i32, %arg1: i32, %arg2: memref<8x128xbf16, #tpu.memory_space<vmem>>, %arg3: memref<8x128xbf16, #tpu.memory_space<vmem>>, %arg4: memref<8x128xbf16, #tpu.memory_space<vmem>>, %arg5: memref<1x1x8xf32, #tpu.memory_space<vmem>>, %arg6: memref<8x128xbf16, #tpu.memory_space<vmem>>) attributes {dimension_semantics = [#tpu.dimension_semantics<parallel>, #tpu.dimension_semantics<parallel>], iteration_bounds = array<i64: 2, 1>, scalar_prefetch = 0 : i64, scratch_operands = 0 : i64, tpu.core_type = #tpu.core_type<tc>, window_params = [{transform_indices = @transform_0, window_bounds = array<i64: 8, 128>}, {transform_indices = @transform_1, window_bounds = array<i64: 8, 128>}, {transform_indices = @transform_2, window_bounds = array<i64: 8, 128>}, {transform_indices = @transform_3, window_bounds = array<i64: 1, 1, 8>}, {transform_indices = @transform_4, window_bounds = array<i64: 8, 128>}]} {
    %c0 = arith.constant 0 : index
    %c0_0 = arith.constant 0 : index
    %c0_1 = arith.constant 0 : index
    %0 = vector.load %arg5[%c0, %c0_0, %c0_1] : memref<1x1x8xf32, #tpu.memory_space<vmem>>, vector<1x1x8xf32>
    %1 = vector.shape_cast %0 : vector<1x1x8xf32> to vector<1x8xf32>
    %cst = arith.constant 1.000000e+00 : f32
    %2 = vector.broadcast %cst : f32 to vector<1x8xf32>
    %3 = arith.subf %2, %1 : vector<1x8xf32>
    %cst_2 = arith.constant -1.000000e+09 : f32
    %4 = vector.broadcast %cst_2 : f32 to vector<1x8xf32>
    %5 = arith.mulf %3, %4 : vector<1x8xf32>
    %c0_3 = arith.constant 0 : index
    %c0_4 = arith.constant 0 : index
    %6 = vector.load %arg2[%c0_3, %c0_4] : memref<8x128xbf16, #tpu.memory_space<vmem>>, vector<8x64xbf16>
    %c0_5 = arith.constant 0 : index
    %c0_6 = arith.constant 0 : index
    %7 = vector.load %arg3[%c0_5, %c0_6] : memref<8x128xbf16, #tpu.memory_space<vmem>>, vector<8x64xbf16>
    %c0_7 = arith.constant 0 : index
    %c0_8 = arith.constant 0 : index
    %8 = vector.load %arg4[%c0_7, %c0_8] : memref<8x128xbf16, #tpu.memory_space<vmem>>, vector<8x64xbf16>
    %cst_9 = arith.constant dense<0.000000e+00> : vector<8x8xf32>
    %9 = tpu.matmul %6, %7, %cst_9 {dimension_numbers = #tpu.dot_dimension_numbers<[1], [1], [0], [0], [0, 0, 1, 0], [], []>} : vector<8x64xbf16>, vector<8x64xbf16>, vector<8x8xf32> -> vector<8x8xf32>
    %cst_10 = arith.constant 1.250000e-01 : f32
    %10 = vector.broadcast %cst_10 : f32 to vector<8x8xf32>
    %11 = arith.mulf %9, %10 : vector<8x8xf32>
    %12 = vector.broadcast %5 : vector<1x8xf32> to vector<8x8xf32>
    %13 = arith.addf %11, %12 : vector<8x8xf32>
    %cst_11 = arith.constant dense<0xFF800000> : vector<8xf32>
    %14 = vector.multi_reduction <maximumf>, %13, %cst_11 [1] : vector<8x8xf32> to vector<8xf32>
    %15 = vector.shape_cast %14 : vector<8xf32> to vector<8x1xf32>
    %16 = vector.broadcast %15 : vector<8x1xf32> to vector<8x8xf32>
    %17 = arith.subf %13, %16 : vector<8x8xf32>
    %18 = math.exp %17 : vector<8x8xf32>
    %cst_12 = arith.constant dense<0.000000e+00> : vector<8xf32>
    %19 = vector.multi_reduction <add>, %18, %cst_12 [1] : vector<8x8xf32> to vector<8xf32>
    %20 = vector.shape_cast %19 : vector<8xf32> to vector<8x1xf32>
    %21 = tpu.reciprocal %20 {approx = true} : vector<8x1xf32> -> vector<8x1xf32>
    %22 = vector.broadcast %21 : vector<8x1xf32> to vector<8x8xf32>
    %23 = arith.mulf %18, %22 : vector<8x8xf32>
    %24 = arith.truncf %23 : vector<8x8xf32> to vector<8x8xbf16>
    %cst_13 = arith.constant dense<0.000000e+00> : vector<8x64xf32>
    %25 = tpu.matmul %24, %8, %cst_13 {dimension_numbers = #tpu.dot_dimension_numbers<[1], [0], [0], [1], [0, 0, 1, 1], [], []>} : vector<8x8xbf16>, vector<8x64xbf16>, vector<8x64xf32> -> vector<8x64xf32>
    %c0_14 = arith.constant 0 : index
    %c64 = arith.constant 64 : index
    %26 = vector.load %arg2[%c0_14, %c64] : memref<8x128xbf16, #tpu.memory_space<vmem>>, vector<8x64xbf16>
    %c0_15 = arith.constant 0 : index
    %c64_16 = arith.constant 64 : index
    %27 = vector.load %arg3[%c0_15, %c64_16] : memref<8x128xbf16, #tpu.memory_space<vmem>>, vector<8x64xbf16>
    %c0_17 = arith.constant 0 : index
    %c64_18 = arith.constant 64 : index
    %28 = vector.load %arg4[%c0_17, %c64_18] : memref<8x128xbf16, #tpu.memory_space<vmem>>, vector<8x64xbf16>
    %cst_19 = arith.constant dense<0.000000e+00> : vector<8x8xf32>
    %29 = tpu.matmul %26, %27, %cst_19 {dimension_numbers = #tpu.dot_dimension_numbers<[1], [1], [0], [0], [0, 0, 1, 0], [], []>} : vector<8x64xbf16>, vector<8x64xbf16>, vector<8x8xf32> -> vector<8x8xf32>
    %cst_20 = arith.constant 1.250000e-01 : f32
    %30 = vector.broadcast %cst_20 : f32 to vector<8x8xf32>
    %31 = arith.mulf %29, %30 : vector<8x8xf32>
    %32 = vector.broadcast %5 : vector<1x8xf32> to vector<8x8xf32>
    %33 = arith.addf %31, %32 : vector<8x8xf32>
    %cst_21 = arith.constant dense<0xFF800000> : vector<8xf32>
    %34 = vector.multi_reduction <maximumf>, %33, %cst_21 [1] : vector<8x8xf32> to vector<8xf32>
    %35 = vector.shape_cast %34 : vector<8xf32> to vector<8x1xf32>
    %36 = vector.broadcast %35 : vector<8x1xf32> to vector<8x8xf32>
    %37 = arith.subf %33, %36 : vector<8x8xf32>
    %38 = math.exp %37 : vector<8x8xf32>
    %cst_22 = arith.constant dense<0.000000e+00> : vector<8xf32>
    %39 = vector.multi_reduction <add>, %38, %cst_22 [1] : vector<8x8xf32> to vector<8xf32>
    %40 = vector.shape_cast %39 : vector<8xf32> to vector<8x1xf32>
    %41 = tpu.reciprocal %40 {approx = true} : vector<8x1xf32> -> vector<8x1xf32>
    %42 = vector.broadcast %41 : vector<8x1xf32> to vector<8x8xf32>
    %43 = arith.mulf %38, %42 : vector<8x8xf32>
    %44 = arith.truncf %43 : vector<8x8xf32> to vector<8x8xbf16>
    %cst_23 = arith.constant dense<0.000000e+00> : vector<8x64xf32>
    %45 = tpu.matmul %44, %28, %cst_23 {dimension_numbers = #tpu.dot_dimension_numbers<[1], [0], [0], [1], [0, 0, 1, 1], [], []>} : vector<8x8xbf16>, vector<8x64xbf16>, vector<8x64xf32> -> vector<8x64xf32>
    %46 = tpu.concatenate %25, %45 in 1 : vector<8x64xf32>, vector<8x64xf32> -> vector<8x128xf32>
    %47 = arith.truncf %46 : vector<8x128xf32> to vector<8x128xbf16>
    %c0_24 = arith.constant 0 : index
    %c0_25 = arith.constant 0 : index
    %48 = vector.load %arg6[%c0_24, %c0_25] : memref<8x128xbf16, #tpu.memory_space<vmem>>, vector<8x128xbf16>
    tpu.vector_store %arg6[%c0_24, %c0_25], %47 {strides = array<i32>} : memref<8x128xbf16, #tpu.memory_space<vmem>>, vector<8x128xbf16>,
    return
  }
  func.func @transform_0(%arg0: i32, %arg1: i32) -> (i32, i32) {
    %c0_i32 = arith.constant 0 : i32
    return %arg0, %arg1 : i32, i32
  }
  func.func @transform_1(%arg0: i32, %arg1: i32) -> (i32, i32) {
    %c1_i32 = arith.constant 1 : i32
    %0 = arith.addi %c1_i32, %arg1 : i32
    %c0_i32 = arith.constant 0 : i32
    return %arg0, %0 : i32, i32
  }
  func.func @transform_2(%arg0: i32, %arg1: i32) -> (i32, i32) {
    %c2_i32 = arith.constant 2 : i32
    %0 = arith.addi %c2_i32, %arg1 : i32
    %c0_i32 = arith.constant 0 : i32
    return %arg0, %0 : i32, i32
  }
  func.func @transform_3(%arg0: i32, %arg1: i32) -> (i32, i32, i32) {
    %c0_i32 = arith.constant 0 : i32
    %c0_i32_0 = arith.constant 0 : i32
    %c0_i32_1 = arith.constant 0 : i32
    return %arg0, %c0_i32, %c0_i32_0 : i32, i32, i32
  }
  func.func @transform_4(%arg0: i32, %arg1: i32) -> (i32, i32) {
    %c0_i32 = arith.constant 0 : i32
    return %arg0, %arg1 : i32, i32
  }
}

module attributes {stable_mosaic.version = 11 : i64} {
  func.func @_linear_kernel(%arg0: i32, %arg1: i32, %arg2: i32, %arg3: memref<16x128xbf16, #tpu.memory_space<vmem>>, %arg4: memref<128x256xbf16, #tpu.memory_space<vmem>>, %arg5: memref<1x256xf32, #tpu.memory_space<vmem>>, %arg6: memref<16x256xbf16, #tpu.memory_space<vmem>>, %arg7: memref<16x256xf32, #tpu.memory_space<vmem>>) attributes {dimension_semantics = [#tpu.dimension_semantics<parallel>, #tpu.dimension_semantics<parallel>, #tpu.dimension_semantics<arbitrary>], iteration_bounds = array<i64: 1, 1, 1>, scalar_prefetch = 0 : i64, scratch_operands = 1 : i64, tpu.core_type = #tpu.core_type<tc>, window_params = [{transform_indices = @transform_0, window_bounds = array<i64: 16, 128>}, {transform_indices = @transform_1, window_bounds = array<i64: 128, 256>}, {transform_indices = @transform_2, window_bounds = array<i64: 1, 256>}, {transform_indices = @transform_3, window_bounds = array<i64: 16, 256>}]} {
    %c0_i32 = arith.constant 0 : i32
    %0 = arith.cmpi eq, %arg2, %c0_i32 : i32
    %1 = arith.extui %0 : i1 to i32
    %c0_i32_0 = arith.constant 0 : i32
    %2 = arith.cmpi ne, %1, %c0_i32_0 : i32
    scf.if %2 {
      %cst_10 = arith.constant 0.000000e+00 : f32
      %12 = vector.broadcast %cst_10 : f32 to vector<16x256xf32>
      %c0_11 = arith.constant 0 : index
      %c0_12 = arith.constant 0 : index
      %13 = vector.load %arg7[%c0_11, %c0_12] : memref<16x256xf32, #tpu.memory_space<vmem>>, vector<16x256xf32>
      tpu.vector_store %arg7[%c0_11, %c0_12], %12 {strides = array<i32>} : memref<16x256xf32, #tpu.memory_space<vmem>>, vector<16x256xf32>,
    } else {
    }
    %c0 = arith.constant 0 : index
    %c0_1 = arith.constant 0 : index
    %3 = vector.load %arg7[%c0, %c0_1] : memref<16x256xf32, #tpu.memory_space<vmem>>, vector<16x256xf32>
    %c0_2 = arith.constant 0 : index
    %c0_3 = arith.constant 0 : index
    %4 = vector.load %arg3[%c0_2, %c0_3] : memref<16x128xbf16, #tpu.memory_space<vmem>>, vector<16x128xbf16>
    %c0_4 = arith.constant 0 : index
    %c0_5 = arith.constant 0 : index
    %5 = vector.load %arg4[%c0_4, %c0_5] : memref<128x256xbf16, #tpu.memory_space<vmem>>, vector<128x256xbf16>
    %cst = arith.constant dense<0.000000e+00> : vector<16x256xf32>
    %6 = tpu.matmul %4, %5, %cst {dimension_numbers = #tpu.dot_dimension_numbers<[1], [0], [0], [1], [0, 0, 1, 1], [], []>} : vector<16x128xbf16>, vector<128x256xbf16>, vector<16x256xf32> -> vector<16x256xf32>
    %7 = arith.addf %3, %6 : vector<16x256xf32>
    %c0_6 = arith.constant 0 : index
    %c0_7 = arith.constant 0 : index
    %8 = vector.load %arg7[%c0_6, %c0_7] : memref<16x256xf32, #tpu.memory_space<vmem>>, vector<16x256xf32>
    tpu.vector_store %arg7[%c0_6, %c0_7], %7 {strides = array<i32>} : memref<16x256xf32, #tpu.memory_space<vmem>>, vector<16x256xf32>,
    %c0_i32_8 = arith.constant 0 : i32
    %9 = arith.cmpi eq, %arg2, %c0_i32_8 : i32
    %10 = arith.extui %9 : i1 to i32
    %c0_i32_9 = arith.constant 0 : i32
    %11 = arith.cmpi ne, %10, %c0_i32_9 : i32
    scf.if %11 {
      %c0_10 = arith.constant 0 : index
      %c0_11 = arith.constant 0 : index
      %12 = vector.load %arg7[%c0_10, %c0_11] : memref<16x256xf32, #tpu.memory_space<vmem>>, vector<16x256xf32>
      %c0_12 = arith.constant 0 : index
      %c0_13 = arith.constant 0 : index
      %13 = vector.load %arg5[%c0_12, %c0_13] : memref<1x256xf32, #tpu.memory_space<vmem>>, vector<1x256xf32>
      %14 = vector.broadcast %13 : vector<1x256xf32> to vector<16x256xf32>
      %15 = arith.addf %12, %14 : vector<16x256xf32>
      %cst_14 = arith.constant 5.000000e-01 : f32
      %16 = vector.broadcast %cst_14 : f32 to vector<16x256xf32>
      %17 = arith.mulf %16, %15 : vector<16x256xf32>
      %cst_15 = arith.constant 4.471500e-02 : f32
      %18 = vector.broadcast %cst_15 : f32 to vector<16x256xf32>
      %19 = arith.mulf %18, %15 : vector<16x256xf32>
      %20 = arith.mulf %19, %15 : vector<16x256xf32>
      %21 = arith.mulf %20, %15 : vector<16x256xf32>
      %22 = arith.addf %15, %21 : vector<16x256xf32>
      %cst_16 = arith.constant 0.797884583 : f32
      %23 = vector.broadcast %cst_16 : f32 to vector<16x256xf32>
      %24 = arith.mulf %23, %22 : vector<16x256xf32>
      %25 = math.tanh %24 : vector<16x256xf32>
      %cst_17 = arith.constant 1.000000e+00 : f32
      %26 = vector.broadcast %cst_17 : f32 to vector<16x256xf32>
      %27 = arith.addf %26, %25 : vector<16x256xf32>
      %28 = arith.mulf %17, %27 : vector<16x256xf32>
      %29 = arith.truncf %28 : vector<16x256xf32> to vector<16x256xbf16>
      %c0_18 = arith.constant 0 : index
      %c0_19 = arith.constant 0 : index
      %30 = vector.load %arg6[%c0_18, %c0_19] : memref<16x256xbf16, #tpu.memory_space<vmem>>, vector<16x256xbf16>
      tpu.vector_store %arg6[%c0_18, %c0_19], %29 {strides = array<i32>} : memref<16x256xbf16, #tpu.memory_space<vmem>>, vector<16x256xbf16>,
    } else {
    }
    return
  }
  func.func @transform_0(%arg0: i32, %arg1: i32, %arg2: i32) -> (i32, i32) {
    %c0_i32 = arith.constant 0 : i32
    return %arg0, %arg2 : i32, i32
  }
  func.func @transform_1(%arg0: i32, %arg1: i32, %arg2: i32) -> (i32, i32) {
    %c0_i32 = arith.constant 0 : i32
    return %arg2, %arg1 : i32, i32
  }
  func.func @transform_2(%arg0: i32, %arg1: i32, %arg2: i32) -> (i32, i32) {
    %c0_i32 = arith.constant 0 : i32
    %c0_i32_0 = arith.constant 0 : i32
    return %c0_i32, %arg1 : i32, i32
  }
  func.func @transform_3(%arg0: i32, %arg1: i32, %arg2: i32) -> (i32, i32) {
    %c0_i32 = arith.constant 0 : i32
    return %arg0, %arg1 : i32, i32
  }
}

module attributes {stable_mosaic.version = 11 : i64} {
  func.func @_linear_res_ln_kernel(%arg0: i32, %arg1: i32, %arg2: memref<16x256xbf16, #tpu.memory_space<vmem>>, %arg3: memref<256x128xbf16, #tpu.memory_space<vmem>>, %arg4: memref<1x128xf32, #tpu.memory_space<vmem>>, %arg5: memref<16x128xbf16, #tpu.memory_space<vmem>>, %arg6: memref<1x128xf32, #tpu.memory_space<vmem>>, %arg7: memref<1x128xf32, #tpu.memory_space<vmem>>, %arg8: memref<16x128xbf16, #tpu.memory_space<vmem>>, %arg9: memref<16x128xf32, #tpu.memory_space<vmem>>) attributes {dimension_semantics = [#tpu.dimension_semantics<parallel>, #tpu.dimension_semantics<arbitrary>], iteration_bounds = array<i64: 1, 1>, scalar_prefetch = 0 : i64, scratch_operands = 1 : i64, tpu.core_type = #tpu.core_type<tc>, window_params = [{transform_indices = @transform_0, window_bounds = array<i64: 16, 256>}, {transform_indices = @transform_1, window_bounds = array<i64: 256, 128>}, {pipeline_mode = #tpu.pipeline_mode<synchronous>, transform_indices = @transform_2, window_bounds = array<i64: 1, 128>}, {transform_indices = @transform_3, window_bounds = array<i64: 16, 128>}, {pipeline_mode = #tpu.pipeline_mode<synchronous>, transform_indices = @transform_4, window_bounds = array<i64: 1, 128>}, {pipeline_mode = #tpu.pipeline_mode<synchronous>, transform_indices = @transform_5, window_bounds = array<i64: 1, 128>}, {transform_indices = @transform_6, window_bounds = array<i64: 16, 128>}]} {
    %c0_i32 = arith.constant 0 : i32
    %0 = arith.cmpi eq, %arg1, %c0_i32 : i32
    %1 = arith.extui %0 : i1 to i32
    %c0_i32_0 = arith.constant 0 : i32
    %2 = arith.cmpi ne, %1, %c0_i32_0 : i32
    scf.if %2 {
      %cst_10 = arith.constant 0.000000e+00 : f32
      %12 = vector.broadcast %cst_10 : f32 to vector<16x128xf32>
      %c0_11 = arith.constant 0 : index
      %c0_12 = arith.constant 0 : index
      %13 = vector.load %arg9[%c0_11, %c0_12] : memref<16x128xf32, #tpu.memory_space<vmem>>, vector<16x128xf32>
      tpu.vector_store %arg9[%c0_11, %c0_12], %12 {strides = array<i32>} : memref<16x128xf32, #tpu.memory_space<vmem>>, vector<16x128xf32>,
    } else {
    }
    %c0 = arith.constant 0 : index
    %c0_1 = arith.constant 0 : index
    %3 = vector.load %arg9[%c0, %c0_1] : memref<16x128xf32, #tpu.memory_space<vmem>>, vector<16x128xf32>
    %c0_2 = arith.constant 0 : index
    %c0_3 = arith.constant 0 : index
    %4 = vector.load %arg2[%c0_2, %c0_3] : memref<16x256xbf16, #tpu.memory_space<vmem>>, vector<16x256xbf16>
    %c0_4 = arith.constant 0 : index
    %c0_5 = arith.constant 0 : index
    %5 = vector.load %arg3[%c0_4, %c0_5] : memref<256x128xbf16, #tpu.memory_space<vmem>>, vector<256x128xbf16>
    %cst = arith.constant dense<0.000000e+00> : vector<16x128xf32>
    %6 = tpu.matmul %4, %5, %cst {dimension_numbers = #tpu.dot_dimension_numbers<[1], [0], [0], [1], [0, 0, 1, 1], [], []>} : vector<16x256xbf16>, vector<256x128xbf16>, vector<16x128xf32> -> vector<16x128xf32>
    %7 = arith.addf %3, %6 : vector<16x128xf32>
    %c0_6 = arith.constant 0 : index
    %c0_7 = arith.constant 0 : index
    %8 = vector.load %arg9[%c0_6, %c0_7] : memref<16x128xf32, #tpu.memory_space<vmem>>, vector<16x128xf32>
    tpu.vector_store %arg9[%c0_6, %c0_7], %7 {strides = array<i32>} : memref<16x128xf32, #tpu.memory_space<vmem>>, vector<16x128xf32>,
    %c0_i32_8 = arith.constant 0 : i32
    %9 = arith.cmpi eq, %arg1, %c0_i32_8 : i32
    %10 = arith.extui %9 : i1 to i32
    %c0_i32_9 = arith.constant 0 : i32
    %11 = arith.cmpi ne, %10, %c0_i32_9 : i32
    scf.if %11 {
      %c0_10 = arith.constant 0 : index
      %c0_11 = arith.constant 0 : index
      %12 = vector.load %arg9[%c0_10, %c0_11] : memref<16x128xf32, #tpu.memory_space<vmem>>, vector<16x128xf32>
      %c0_12 = arith.constant 0 : index
      %c0_13 = arith.constant 0 : index
      %13 = vector.load %arg4[%c0_12, %c0_13] : memref<1x128xf32, #tpu.memory_space<vmem>>, vector<1x128xf32>
      %14 = vector.broadcast %13 : vector<1x128xf32> to vector<16x128xf32>
      %15 = arith.addf %12, %14 : vector<16x128xf32>
      %c0_14 = arith.constant 0 : index
      %c0_15 = arith.constant 0 : index
      %16 = vector.load %arg5[%c0_14, %c0_15] : memref<16x128xbf16, #tpu.memory_space<vmem>>, vector<16x128xbf16>
      %17 = arith.extf %16 : vector<16x128xbf16> to vector<16x128xf32>
      %18 = arith.addf %15, %17 : vector<16x128xf32>
      %cst_16 = arith.constant dense<0.000000e+00> : vector<16xf32>
      %19 = vector.multi_reduction <add>, %18, %cst_16 [1] : vector<16x128xf32> to vector<16xf32>
      %20 = vector.shape_cast %19 : vector<16xf32> to vector<16x1xf32>
      %cst_17 = arith.constant 1.280000e+02 : f32
      %21 = vector.broadcast %cst_17 : f32 to vector<16x1xf32>
      %22 = arith.divf %20, %21 : vector<16x1xf32>
      %23 = vector.broadcast %22 : vector<16x1xf32> to vector<16x128xf32>
      %24 = arith.subf %18, %23 : vector<16x128xf32>
      %25 = arith.mulf %24, %24 : vector<16x128xf32>
      %cst_18 = arith.constant dense<0.000000e+00> : vector<16xf32>
      %26 = vector.multi_reduction <add>, %25, %cst_18 [1] : vector<16x128xf32> to vector<16xf32>
      %27 = vector.shape_cast %26 : vector<16xf32> to vector<16x1xf32>
      %cst_19 = arith.constant 1.280000e+02 : f32
      %28 = vector.broadcast %cst_19 : f32 to vector<16x1xf32>
      %29 = arith.divf %27, %28 : vector<16x1xf32>
      %30 = vector.broadcast %22 : vector<16x1xf32> to vector<16x128xf32>
      %31 = arith.subf %18, %30 : vector<16x128xf32>
      %cst_20 = arith.constant 9.99999996E-13 : f32
      %32 = vector.broadcast %cst_20 : f32 to vector<16x1xf32>
      %33 = arith.addf %29, %32 : vector<16x1xf32>
      %34 = math.rsqrt %33 : vector<16x1xf32>
      %35 = vector.broadcast %34 : vector<16x1xf32> to vector<16x128xf32>
      %36 = arith.mulf %31, %35 : vector<16x128xf32>
      %c0_21 = arith.constant 0 : index
      %c0_22 = arith.constant 0 : index
      %37 = vector.load %arg6[%c0_21, %c0_22] : memref<1x128xf32, #tpu.memory_space<vmem>>, vector<1x128xf32>
      %38 = vector.broadcast %37 : vector<1x128xf32> to vector<16x128xf32>
      %39 = arith.mulf %36, %38 : vector<16x128xf32>
      %c0_23 = arith.constant 0 : index
      %c0_24 = arith.constant 0 : index
      %40 = vector.load %arg7[%c0_23, %c0_24] : memref<1x128xf32, #tpu.memory_space<vmem>>, vector<1x128xf32>
      %41 = vector.broadcast %40 : vector<1x128xf32> to vector<16x128xf32>
      %42 = arith.addf %39, %41 : vector<16x128xf32>
      %43 = arith.truncf %42 : vector<16x128xf32> to vector<16x128xbf16>
      %c0_25 = arith.constant 0 : index
      %c0_26 = arith.constant 0 : index
      %44 = vector.load %arg8[%c0_25, %c0_26] : memref<16x128xbf16, #tpu.memory_space<vmem>>, vector<16x128xbf16>
      tpu.vector_store %arg8[%c0_25, %c0_26], %43 {strides = array<i32>} : memref<16x128xbf16, #tpu.memory_space<vmem>>, vector<16x128xbf16>,
    } else {
    }
    return
  }
  func.func @transform_0(%arg0: i32, %arg1: i32) -> (i32, i32) {
    %c0_i32 = arith.constant 0 : i32
    return %arg0, %arg1 : i32, i32
  }
  func.func @transform_1(%arg0: i32, %arg1: i32) -> (i32, i32) {
    %c0_i32 = arith.constant 0 : i32
    %c0_i32_0 = arith.constant 0 : i32
    return %arg1, %c0_i32 : i32, i32
  }
  func.func @transform_2(%arg0: i32, %arg1: i32) -> (i32, i32) {
    %c0_i32 = arith.constant 0 : i32
    %c0_i32_0 = arith.constant 0 : i32
    %c0_i32_1 = arith.constant 0 : i32
    return %c0_i32, %c0_i32_0 : i32, i32
  }
  func.func @transform_3(%arg0: i32, %arg1: i32) -> (i32, i32) {
    %c0_i32 = arith.constant 0 : i32
    %c0_i32_0 = arith.constant 0 : i32
    return %arg0, %c0_i32 : i32, i32
  }
  func.func @transform_4(%arg0: i32, %arg1: i32) -> (i32, i32) {
    %c0_i32 = arith.constant 0 : i32
    %c0_i32_0 = arith.constant 0 : i32
    %c0_i32_1 = arith.constant 0 : i32
    return %c0_i32, %c0_i32_0 : i32, i32
  }
  func.func @transform_5(%arg0: i32, %arg1: i32) -> (i32, i32) {
    %c0_i32 = arith.constant 0 : i32
    %c0_i32_0 = arith.constant 0 : i32
    %c0_i32_1 = arith.constant 0 : i32
    return %c0_i32, %c0_i32_0 : i32, i32
  }
  func.func @transform_6(%arg0: i32, %arg1: i32) -> (i32, i32) {
    %c0_i32 = arith.constant 0 : i32
    %c0_i32_0 = arith.constant 0 : i32
    return %arg0, %c0_i32 : i32, i32
  }
}

module attributes {stable_mosaic.version = 11 : i64} {
  func.func @_idf_pool_kernel(%arg0: i32, %arg1: memref<2x8x128xbf16, #tpu.memory_space<vmem>>, %arg2: memref<2x1x8xf32, #tpu.memory_space<vmem>>, %arg3: memref<2x1x1xf32, #tpu.memory_space<vmem>>, %arg4: memref<2x1x128xf32, #tpu.memory_space<vmem>>) attributes {dimension_semantics = [#tpu.dimension_semantics<parallel>], iteration_bounds = array<i64: 1>, scalar_prefetch = 0 : i64, scratch_operands = 0 : i64, tpu.core_type = #tpu.core_type<tc>, window_params = [{transform_indices = @transform_0, window_bounds = array<i64: 2, 8, 128>}, {transform_indices = @transform_1, window_bounds = array<i64: 2, 1, 8>}, {transform_indices = @transform_2, window_bounds = array<i64: 2, 1, 1>}, {transform_indices = @transform_3, window_bounds = array<i64: 2, 1, 128>}]} {
    %c0 = arith.constant 0 : index
    %c0_0 = arith.constant 0 : index
    %c0_1 = arith.constant 0 : index
    %0 = vector.load %arg2[%c0, %c0_0, %c0_1] : memref<2x1x8xf32, #tpu.memory_space<vmem>>, vector<1x1x8xf32>
    %1 = vector.shape_cast %0 : vector<1x1x8xf32> to vector<1x8xf32>
    %c0_2 = arith.constant 0 : index
    %c0_3 = arith.constant 0 : index
    %c0_4 = arith.constant 0 : index
    %2 = vector.load %arg1[%c0_2, %c0_3, %c0_4] : memref<2x8x128xbf16, #tpu.memory_space<vmem>>, vector<1x8x128xbf16>
    %3 = vector.shape_cast %2 : vector<1x8x128xbf16> to vector<8x128xbf16>
    %4 = arith.extf %3 : vector<8x128xbf16> to vector<8x128xf32>
    %cst = arith.constant dense<0.000000e+00> : vector<1x128xf32>
    %5 = tpu.matmul %1, %4, %cst {dimension_numbers = #tpu.dot_dimension_numbers<[1], [0], [0], [1], [0, 0, 1, 1], [], []>} : vector<1x8xf32>, vector<8x128xf32>, vector<1x128xf32> -> vector<1x128xf32>
    %c0_5 = arith.constant 0 : index
    %c0_6 = arith.constant 0 : index
    %c0_7 = arith.constant 0 : index
    %6 = vector.load %arg3[%c0_5, %c0_6, %c0_7] : memref<2x1x1xf32, #tpu.memory_space<vmem>>, vector<1x1x1xf32>
    %7 = vector.shape_cast %6 : vector<1x1x1xf32> to vector<1x1xf32>
    %8 = vector.broadcast %7 : vector<1x1xf32> to vector<1x128xf32>
    %9 = arith.mulf %5, %8 : vector<1x128xf32>
    %c0_8 = arith.constant 0 : index
    %c0_9 = arith.constant 0 : index
    %c0_10 = arith.constant 0 : index
    %10 = vector.load %arg4[%c0_8, %c0_9, %c0_10] : memref<2x1x128xf32, #tpu.memory_space<vmem>>, vector<1x1x128xf32>
    %11 = vector.shape_cast %10 : vector<1x1x128xf32> to vector<1x128xf32>
    %12 = vector.shape_cast %9 : vector<1x128xf32> to vector<1x1x128xf32>
    tpu.vector_store %arg4[%c0_8, %c0_9, %c0_10], %12 {strides = array<i32>} : memref<2x1x128xf32, #tpu.memory_space<vmem>>, vector<1x1x128xf32>,
    %c1 = arith.constant 1 : index
    %c0_11 = arith.constant 0 : index
    %c0_12 = arith.constant 0 : index
    %13 = vector.load %arg2[%c1, %c0_11, %c0_12] : memref<2x1x8xf32, #tpu.memory_space<vmem>>, vector<1x1x8xf32>
    %14 = vector.shape_cast %13 : vector<1x1x8xf32> to vector<1x8xf32>
    %c1_13 = arith.constant 1 : index
    %c0_14 = arith.constant 0 : index
    %c0_15 = arith.constant 0 : index
    %15 = vector.load %arg1[%c1_13, %c0_14, %c0_15] : memref<2x8x128xbf16, #tpu.memory_space<vmem>>, vector<1x8x128xbf16>
    %16 = vector.shape_cast %15 : vector<1x8x128xbf16> to vector<8x128xbf16>
    %17 = arith.extf %16 : vector<8x128xbf16> to vector<8x128xf32>
    %cst_16 = arith.constant dense<0.000000e+00> : vector<1x128xf32>
    %18 = tpu.matmul %14, %17, %cst_16 {dimension_numbers = #tpu.dot_dimension_numbers<[1], [0], [0], [1], [0, 0, 1, 1], [], []>} : vector<1x8xf32>, vector<8x128xf32>, vector<1x128xf32> -> vector<1x128xf32>
    %c1_17 = arith.constant 1 : index
    %c0_18 = arith.constant 0 : index
    %c0_19 = arith.constant 0 : index
    %19 = vector.load %arg3[%c1_17, %c0_18, %c0_19] : memref<2x1x1xf32, #tpu.memory_space<vmem>>, vector<1x1x1xf32>
    %20 = vector.shape_cast %19 : vector<1x1x1xf32> to vector<1x1xf32>
    %21 = vector.broadcast %20 : vector<1x1xf32> to vector<1x128xf32>
    %22 = arith.mulf %18, %21 : vector<1x128xf32>
    %c1_20 = arith.constant 1 : index
    %c0_21 = arith.constant 0 : index
    %c0_22 = arith.constant 0 : index
    %23 = vector.load %arg4[%c1_20, %c0_21, %c0_22] : memref<2x1x128xf32, #tpu.memory_space<vmem>>, vector<1x1x128xf32>
    %24 = vector.shape_cast %23 : vector<1x1x128xf32> to vector<1x128xf32>
    %25 = vector.shape_cast %22 : vector<1x128xf32> to vector<1x1x128xf32>
    tpu.vector_store %arg4[%c1_20, %c0_21, %c0_22], %25 {strides = array<i32>} : memref<2x1x128xf32, #tpu.memory_space<vmem>>, vector<1x1x128xf32>,
    return
  }
  func.func @transform_0(%arg0: i32) -> (i32, i32, i32) {
    %c0_i32 = arith.constant 0 : i32
    %c0_i32_0 = arith.constant 0 : i32
    %c0_i32_1 = arith.constant 0 : i32
    return %arg0, %c0_i32, %c0_i32_0 : i32, i32, i32
  }
  func.func @transform_1(%arg0: i32) -> (i32, i32, i32) {
    %c0_i32 = arith.constant 0 : i32
    %c0_i32_0 = arith.constant 0 : i32
    %c0_i32_1 = arith.constant 0 : i32
    return %arg0, %c0_i32, %c0_i32_0 : i32, i32, i32
  }
  func.func @transform_2(%arg0: i32) -> (i32, i32, i32) {
    %c0_i32 = arith.constant 0 : i32
    %c0_i32_0 = arith.constant 0 : i32
    %c0_i32_1 = arith.constant 0 : i32
    return %arg0, %c0_i32, %c0_i32_0 : i32, i32, i32
  }
  func.func @transform_3(%arg0: i32) -> (i32, i32, i32) {
    %c0_i32 = arith.constant 0 : i32
    %c0_i32_0 = arith.constant 0 : i32
    %c0_i32_1 = arith.constant 0 : i32
    return %arg0, %c0_i32, %c0_i32_0 : i32, i32, i32
  }
}

</mosaic_0001>

<bundles_post_ra>
// kernel: sbert_forward.14
= control target key start
LH: loop header
LB: loop body
LE: loop exit
PB: predicated region body
PF: predicated region fallthrough
CT: control target
= control target key end

     0   :  { %v314_v1 = vmov 0   ;;  %v191_v18 = vlaneseq  ;;  %s395_s1 = inlined_call_operand.vmem [shape: bf16[128,256], index: 1, kind: input, shape index: {}]   ;;  %s396_s0 = inlined_call_operand.vmem [shape: bf16[16,128], index: 0, kind: input, shape index: {}]   ;;  %s397_s2 = inlined_call_operand.vmem [shape: f32[1,256], index: 2, kind: input, shape index: {}]   ;;  %s398_s3 = inlined_call_operand.vmem [shape: bf16[16,256], index: 3, kind: output, shape index: {}]  }
   0x1   :  { %v281_v0 = vld [vmem:[%s395_s1 + $0x74] ss:$8 sps:$4 sm:$0xff]   ;;  %163 = vmatprep.mubr.bf16.mxu0 %v314_v1  ;;  %v283_v2 = vld [vmem:[%s395_s1 + $0x70] ss:$8 sps:$4 sm:$0xff]   ;;  %v284_v3 = vld [vmem:[%s395_s1 + $0x64] ss:$8 sps:$4 sm:$0xff]  }
   0x2   :  { %131 = vmatprep.subr.bf16.mxu0 %v281_v0  ;;  %v286_v4 = vld [vmem:[%s395_s1 + $0x60] ss:$8 sps:$4 sm:$0xff]   ;;  %v287_v5 = vld [vmem:[%s395_s1 + $0x54] ss:$8 sps:$4 sm:$0xff]   ;;  %v289_v6 = vld [vmem:[%s395_s1 + $0x50] ss:$8 sps:$4 sm:$0xff]  }
   0x3   :  { %132 = vmatpush1.bf16.msra.mxu0 %v283_v2  ;;  %v290_v7 = vld [vmem:[%s395_s1 + $0x44] ss:$8 sps:$4 sm:$0xff]   ;;  %v292_v8 = vld [vmem:[%s395_s1 + $0x40] ss:$8 sps:$4 sm:$0xff]   ;;  %v293_v9 = vld [vmem:[%s395_s1 + $0x34] ss:$8 sps:$4 sm:$0xff]  }
   0x4   :  { %133 = vmatprep.subr.bf16.mxu0 %v284_v3  ;;  %v295_v10 = vld [vmem:[%s395_s1 + $0x30] ss:$8 sps:$4 sm:$0xff]   ;;  %v296_v11 = vld [vmem:[%s395_s1 + $0x24] ss:$8 sps:$4 sm:$0xff]   ;;  %v298_v12 = vld [vmem:[%s395_s1 + $0x20] ss:$8 sps:$4 sm:$0xff]  }
   0x5   :  { %v299_v13 = vld [vmem:[%s395_s1 + $0x14] ss:$8 sps:$4 sm:$0xff]   ;;  %v301_v14 = vld [vmem:[%s395_s1 + $0x10] ss:$8 sps:$4 sm:$0xff]   ;;  %v302_v15 = vld [vmem:[%s395_s1 + $0x4] ss:$8 sps:$4 sm:$0xff]  }
   0x6   :  { %v304_v16 = vld [vmem:[%s395_s1] ss:$8 sps:$4 sm:$0xff]   ;;  %v192_v19 = vshrl.u32 %v191_v18, 7 }
   0x7   :  { %134 = vmatpush1.bf16.msra.mxu0 %v286_v4  ;;  %v305_v17 = vld [vmem:[%s396_s0] sm:$0xff]  }
   0x8   :  { %135 = vmatprep.subr.bf16.mxu0 %v287_v5  ;;  %v193_v20 = vsub.s32 0, %v192_v19  ;;  %v189_v21 = vld [vmem:[%s397_s2] sm:$0x3]  ;;  %v197_v22 = vsub.s32 1, %v192_v19 }
   0xa   :  { %v194_v23 = vrot.slane %v189_v21, %v193_v20  ;;  %v198_v24 = vrot.slane %v189_v21, %v197_v22 }
   0xb   :  { %136 = vmatpush1.bf16.msra.mxu0 %v289_v6 }
   0xc   :  { %137 = vmatprep.subr.bf16.mxu0 %v290_v7 }
   0xf   :  { %138 = vmatpush1.bf16.msra.mxu0 %v292_v8 }
  0x10   :  { %139 = vmatprep.subr.bf16.mxu0 %v293_v9 }
  0x13   :  { %140 = vmatpush1.bf16.msra.mxu0 %v295_v10 }
  0x14   :  { %141 = vmatprep.subr.bf16.mxu0 %v296_v11 }
  0x17   :  { %142 = vmatpush1.bf16.msra.mxu0 %v298_v12 }
  0x18   :  { %143 = vmatprep.subr.bf16.mxu0 %v299_v13 }
  0x1b   :  { %144 = vmatpush1.bf16.msra.mxu0 %v301_v14 }
  0x1c   :  { %145 = vmatprep.subr.bf16.mxu0 %v302_v15 }
  0x1f   :  { %146 = vmatpush1.bf16.msra.mxu0 %v304_v16 }
  0x22   :  { %164 = vmatmul.mubr.bf16.vlgmr.msra.gmra.mxu0 %v305_v17 }
  0xe2   :  { %v165_v25 = vpop.f32.mrf.mxu0 }
  0xe3   :  { %v201_v26 = vadd.f32 %v194_v23, %v165_v25 }
  0xe4   :  { %v167_v27 = vpop.f32.mrf.mxu0 }
  0xe5   :  { %v209_v28 = vmul.f32 0.044715, %v201_v26  ;;  %v202_v29 = vadd.f32 %v198_v24, %v167_v27  ;;  %v205_v56 = vmul.f32 0.5, %v201_v26 }
  0xe6   :  { %v169_v30 = vpop.f32.mrf.mxu0 }
  0xe7   :  { %v213_v31 = vmul.f32 %v209_v28, %v201_v26  ;;  %v210_v32 = vmul.f32 0.044715, %v202_v29  ;;  %v203_v33 = vadd.f32 %v194_v23, %v169_v30  ;;  %v206_v57 = vmul.f32 0.5, %v202_v29 }
  0xe8   :  { %v171_v34 = vpop.f32.mrf.mxu0 }
  0xe9   :  { %v217_v35 = vmul.f32 %v213_v31, %v201_v26  ;;  %v214_v36 = vmul.f32 %v210_v32, %v202_v29  ;;  %v211_v37 = vmul.f32 0.044715, %v203_v33  ;;  %v204_v38 = vadd.f32 %v198_v24, %v171_v34 }
  0xea   :  { %v207_v1 = vmul.f32 0.5, %v203_v33 }
  0xeb   :  { %v221_v39 = vadd.f32 %v217_v35, %v201_v26  ;;  %v218_v40 = vmul.f32 %v214_v36, %v202_v29  ;;  %v215_v41 = vmul.f32 %v211_v37, %v203_v33  ;;  %v212_v42 = vmul.f32 0.044715, %v204_v38 }
  0xec   :  { %v208_v2 = vmul.f32 0.5, %v204_v38 }
  0xed   :  { %v225_v43 = vmul.f32 0.7978846, %v221_v39  ;;  %v222_v44 = vadd.f32 %v218_v40, %v202_v29  ;;  %v219_v45 = vmul.f32 %v215_v41, %v203_v33  ;;  %v216_v46 = vmul.f32 %v212_v42, %v204_v38 }
  0xef   :  { %306 = vtanh.f32 %v225_v43  ;;  %v226_v47 = vmul.f32 0.7978846, %v222_v44  ;;  %v223_v48 = vadd.f32 %v219_v45, %v203_v33  ;;  %v220_v49 = vmul.f32 %v216_v46, %v204_v38 }
  0xf1   :  { %308 = vtanh.f32 %v226_v47  ;;  %v227_v50 = vmul.f32 0.7978846, %v223_v48  ;;  %v224_v51 = vadd.f32 %v220_v49, %v204_v38 }
  0xf3   :  { %310 = vtanh.f32 %v227_v50  ;;  %v228_v52 = vmul.f32 0.7978846, %v224_v51 }
  0xf5   :  { %312 = vtanh.f32 %v228_v52 }
  0xfc   :  { %v307_v53 = vpop.eup %306 }
  0xfd   :  { %v233_v54 = vadd.f32 1.0, %v307_v53 }
  0xfe   :  { %v309_v55 = vpop.eup %308 }
  0xff   :  { %v234_v58 = vadd.f32 1.0, %v309_v55  ;;  %v237_v60 = vmul.f32 %v233_v54, %v205_v56 }
 0x100   :  { %v311_v59 = vpop.eup %310 }
 0x101   :  { %v238_v61 = vmul.f32 %v234_v58, %v206_v57  ;;  %v235_v62 = vadd.f32 1.0, %v311_v59 }
 0x102   :  { %v313_v63 = vpop.eup %312 }
 0x103   :  { %v278_v0 = vpack.c.bf16 %v238_v61, %v237_v60  ;;  %v236_v3 = vadd.f32 1.0, %v313_v63  ;;  %v239_v4 = vmul.f32 %v235_v62, %v207_v1 }
 0x105   :  { %253 = vst [vmem:[%s398_s3] sm:$0xff] %v278_v0  ;;  %v240_v5 = vmul.f32 %v236_v3, %v208_v2 }
 0x107   :  { %v279_v6 = vpack.c.bf16 %v240_v5, %v239_v4 }
 0x109   :  { %254 = vst [vmem:[%s398_s3 + $0x8] sm:$0xff] %v279_v6 }

// kernel: sbert_forward.13
= control target key start
LH: loop header
LB: loop body
LE: loop exit
PB: predicated region body
PF: predicated region fallthrough
CT: control target
= control target key end

     0   :  { %v293_v0 = vmov 0.0   ;;  %vm294_vm0 = vmmov 0   ;;  %s372_s1 = inlined_call_operand.vmem [shape: bf16[128,128], index: 1, kind: input, shape index: {}]   ;;  %s373_s0 = inlined_call_operand.vmem [shape: bf16[16,128], index: 0, kind: input, shape index: {}]   ;;  %s374_s3 = inlined_call_operand.vmem [shape: bf16[16,128], index: 3, kind: input, shape index: {}]   ;;  %s375_s2 = inlined_call_operand.vmem [shape: f32[1,128], index: 2, kind: input, shape index: {}]   ;;  %s376_s4 = inlined_call_operand.vmem [shape: f32[1,128], index: 4, kind: input, shape index: {}]   ;;  %s377_s5 = inlined_call_operand.vmem [shape: f32[1,128], index: 5, kind: input, shape index: {}]   ;;  %s378_s6 = inlined_call_operand.vmem [shape: bf16[16,128], index: 6, kind: output, shape index: {}]  }
   0x1   :  { %258 = vmatprep.subr.bf16.mxu0 %v293_v0  ;;  %v280_v1 = vld [vmem:[%s372_s1 + $0x38] sm:$0xff]   ;;  %274 = vmatprep.mubr.msk.bf16.mxu0 %vm294_vm0, %v293_v0  ;;  %v281_v2 = vld [vmem:[%s372_s1 + $0x30] sm:$0xff]   ;;  %v282_v3 = vld [vmem:[%s372_s1 + $0x28] sm:$0xff]  }
   0x2   :  { %259 = vmatpush3.bf16.msra.mxu0 %v280_v1  ;;  %v283_v4 = vld [vmem:[%s372_s1 + $0x20] sm:$0xff]   ;;  %v284_v5 = vld [vmem:[%s372_s1 + $0x18] sm:$0xff]   ;;  %v285_v6 = vld [vmem:[%s372_s1 + $0x10] sm:$0xff]  }
   0x3   :  { %260 = vmatprep.subr.bf16.mxu0 %v293_v0  ;;  %v286_v7 = vld [vmem:[%s372_s1 + $0x8] sm:$0xff]   ;;  %v287_v8 = vld [vmem:[%s372_s1] sm:$0xff]  }
   0x4   :  { %v288_v9 = vld [vmem:[%s373_s0] sm:$0xff]  }
   0x5   :  { %v241_v10 = vld [vmem:[%s374_s3] sm:$0xff]  }
   0x6   :  { %261 = vmatpush3.bf16.msra.mxu0 %v281_v2  ;;  %v233_v11 = vld [vmem:[%s375_s2] ss:$0 sm:$0xff]  ;;  %v242_v12 = vunpack.c.l.bf16 %v241_v10  ;;  %v243_v17 = vunpack.c.h.bf16 %v241_v10 }
   0x7   :  { %262 = vmatprep.subr.bf16.mxu0 %v293_v0  ;;  %v234_v38 = vld [vmem:[%s376_s4] ss:$0 sm:$0xff] }
   0x8   :  { %v235_v42 = vld [vmem:[%s377_s5] ss:$0 sm:$0xff] }
   0xa   :  { %263 = vmatpush3.bf16.msra.mxu0 %v282_v3 }
   0xb   :  { %264 = vmatprep.subr.bf16.mxu0 %v293_v0 }
   0xe   :  { %265 = vmatpush3.bf16.msra.mxu0 %v283_v4 }
   0xf   :  { %266 = vmatprep.subr.bf16.mxu0 %v293_v0 }
  0x12   :  { %267 = vmatpush3.bf16.msra.mxu0 %v284_v5 }
  0x13   :  { %268 = vmatprep.subr.bf16.mxu0 %v293_v0 }
  0x16   :  { %269 = vmatpush3.bf16.msra.mxu0 %v285_v6 }
  0x17   :  { %270 = vmatprep.subr.bf16.mxu0 %v293_v0 }
  0x1a   :  { %271 = vmatpush3.bf16.msra.mxu0 %v286_v7 }
  0x1b   :  { %272 = vmatprep.subr.bf16.mxu0 %v293_v0 }
  0x1e   :  { %273 = vmatpush3.bf16.msra.mxu0 %v287_v8 }
  0x21   :  { %275 = vmatmul.mubr.bf16.vlgmr.msra.gmra.mxu0 %v288_v9 }
  0xe1   :  { %v138_v13 = vpop.f32.mrf.mxu0 }
  0xe2   :  { %v161_v14 = vadd.f32 %v233_v11, %v138_v13 }
  0xe3   :  { %v276_v15 = vpop.f32.mrf.mxu0 }
  0xe4   :  { %v167_v16 = vadd.f32 %v242_v12, %v161_v14 }
  0xe5   :  { %v141_v18 = vpop.f32.mrf.mxu0 }
  0xe6   :  { %v162_v19 = vadd.f32 %v233_v11, %v141_v18  ;;  %169 = vadd.xlane.f32.xlu0 %v167_v16 }
  0xe7   :  { %v277_v20 = vpop.f32.mrf.mxu0 }
  0xe8   :  { %v168_v21 = vadd.f32 %v243_v17, %v162_v19 }
  0xea   :  { %171 = vadd.xlane.f32.xlu0 %v168_v21 }
 0x16f   :  { %v170_v22 = vpop.xlane.xlu0 %169 }
 0x170   :  { %v174_v23 = vmul.f32 0.0078125, %v170_v22 }
 0x172   :  { %v176_v24 = vsub.f32 %v167_v16, %v174_v23 }
 0x173   :  { %v172_v25 = vpop.xlane.xlu0 %171 }
 0x174   :  { %v175_v26 = vmul.f32 0.0078125, %v172_v25  ;;  %v178_v27 = vmul.f32 %v176_v24, %v176_v24 }
 0x176   :  { %v177_v28 = vsub.f32 %v168_v21, %v175_v26  ;;  %180 = vadd.xlane.f32.xlu1 %v178_v27 }
 0x178   :  { %v179_v29 = vmul.f32 %v177_v28, %v177_v28 }
 0x17a   :  { %182 = vadd.xlane.f32.xlu1 %v179_v29 }
 0x1ff   :  { %v181_v30 = vpop.xlane.xlu1 %180 }
 0x200   :  { %v184_v31 = vmul.f32 0.0078125, %v181_v30 }
 0x202   :  { %v186_v32 = vadd.f32 1e-12, %v184_v31 }
 0x203   :  { %v183_v33 = vpop.xlane.xlu1 %182 }
 0x204   :  { %289 = vrsqrt.f32 %v186_v32  ;;  %v185_v34 = vmul.f32 0.0078125, %v183_v33 }
 0x206   :  { %v187_v35 = vadd.f32 1e-12, %v185_v34 }
 0x208   :  { %291 = vrsqrt.f32 %v187_v35 }
 0x211   :  { %v290_v36 = vpop.eup %289 }
 0x212   :  { %v190_v37 = vmul.f32 %v290_v36, %v176_v24 }
 0x214   :  { %v199_v40 = vmul.f32 %v234_v38, %v190_v37 }
 0x215   :  { %v292_v39 = vpop.eup %291 }
 0x216   :  { %v191_v41 = vmul.f32 %v292_v39, %v177_v28  ;;  %v208_v44 = vadd.f32 %v235_v42, %v199_v40 }
 0x218   :  { %v200_v43 = vmul.f32 %v234_v38, %v191_v41 }
 0x21a   :  { %v209_v45 = vadd.f32 %v235_v42, %v200_v43 }
 0x21c   :  { %v247_v46 = vpack.c.bf16 %v209_v45, %v208_v44 }
 0x21e   :  { %248 = vst [vmem:[%s378_s6] sm:$0xff] %v247_v46  }

// kernel: sbert_forward.12
= control target key start
LH: loop header
LB: loop body
LE: loop exit
PB: predicated region body
PF: predicated region fallthrough
CT: control target
= control target key end

     0   :  { %s836_s15 = smov 0   ;;  %s838_s16 = smov 0   ;;  %s917_s0 = inlined_call_operand.vmem [shape: bf16[16,384], index: 0, kind: input, shape index: {}, may-alias: {0,1,2}]   ;;  %s918_s1 = inlined_call_operand.vmem [shape: bf16[16,384], index: 1, kind: input, shape index: {}, may-alias: {0,1,2}]   ;;  %s919_s2 = inlined_call_operand.vmem [shape: bf16[16,384], index: 2, kind: input, shape index: {}, may-alias: {0,1,2}]   ;;  %s920_s3 = inlined_call_operand.vmem [shape: f32[2,1,8], index: 3, kind: input, shape index: {}]   ;;  %s921_s4 = inlined_call_operand.vmem [shape: bf16[16,128], index: 4, kind: output, shape index: {}]  }
   0x1   :  { %s840_s17 = smov 0  }
   0x2 LB: > { %s26_s18 = sadd.s32 1, %s802_s16  ;;  %p693_p0 = scmp.ge.s32.totalorder %s806_s17, 1  ;;  %s806_s17 = sphi %s840_s17, %s14_s17   ;;  %s802_s16 = sphi %s838_s16, %s923_s16   ;;  %s798_s15 = sphi %s836_s15, %s922_s15  }
   0x3   : > { %p28_p1 = scmp.ge.s32.totalorder %s26_s18, 2  ;;  %p227_p2 = scmp.lt.s32.totalorder %s806_s17, 3 }
   0x5   : > { %s925_s18 = smov (%p28_p1, %s26_s18), 0  ;;  %p228_p3 = pnand %p693_p0, %p227_p2 }
   0x6   : > { %p279_p4 = scmp.lt.s32.totalorder (!%p228_p3), %s798_s15, 1  ;;  %s810_s30 = smov (!%p228_p3), 64  }
   0x7   : > { %231 = sbr.rel (%p228_p3) target bundleno = 1368 (0x558), region = 36 }
   0xc   : > { %v808_v0 = vmov 0.0   ;;  %vm809_vm0 = vmmov 0   ;;  %s927_s15 = smov (!%p279_p4, %s798_s15), 1  ;;  %vm324_vm1 = vcmask 523264   ;;  %v373_v4 = vlaneseq }
   0xd   : > { %719 = vmatprep.subr.bf16.mxu0 %v808_v0  ;;  %721 = vmatprep.mubr.msk.bf16.mxu0 %vm809_vm0, %v808_v0  ;;  %s863_s19 = smul.u32 12, %s927_s15  ;;  %s309_s29 = scalar_lea.vmem %s920_s3, %s927_s15  ;;  %vm379_vm2 = vcmask 64512   ;;  %vm395_vm3 = vcmask 1043456  }
   0xe   : > { %725 = vmatprep.subr.bf16.mxu1 %v808_v0  ;;  %727 = vmatprep.mubr.msk.bf16.mxu1 %vm809_vm0, %v808_v0  ;;  %v318_v5 = vld [vmem:[%s309_s29] sm:$0x1]  ;;  %v374_v7 = vshrl.u32 %v373_v4, 7  ;;  %s697_s9 = sshll.u32 %s927_s15, 2 }
   0xf   : > { %s708_s20 = sadd.s32 4, %s863_s19  ;;  %s286_s26 = scalar_lea.vmem %s917_s0, %s863_s19  ;;  %v319_v6 = vsub.f32 1.0, %v318_v5 }
  0x10   : > { %s295_s23 = scalar_lea.vmem %s918_s1, %s708_s20  ;;  %v321_v3 = vld [vmem:[%s286_s26] sm:$0xf]  ;;  %v375_v9 = vsub.s32 0, %v374_v7  ;;  %s710_s5 = sadd.s32 8, %s863_s19 }
  0x11   : > { %v322_v1 = vld [vmem:[%s295_s23] sm:$0xf]  ;;  %v320_v8 = vmul.f32 -1e+09, %v319_v6  ;;  %v700_v19 = vcombine.low %v321_v3, %v321_v3  ;;  %s305_s8 = scalar_lea.vmem %s919_s2, %s710_s5  ;;  %s316_s12 = scalar_lea.vmem %s921_s4, %s697_s9 }
  0x12   : > { %v329_v2 = vsel %vm324_vm1, %v322_v1, 0  ;;  %v701_v18 = vcombine.low %v322_v1, %v322_v1  ;;  %v323_v25 = vld [vmem:[%s305_s8] sm:$0xf] }
  0x13   : > { %720 = vmatpush3.bf16.xpose.msra.mxu0 %v329_v2  ;;  %v376_v10 = vrot.slane %v320_v8, %v375_v9  ;;  %v397_v26 = vsel %vm395_vm3, %v323_v25, 0  ;;  %v703_v45 = vcombine.low %v323_v25, %v323_v25 }
  0x14   : > { %737 = vmatprep.subr.bf16.mxu0 %v808_v0  ;;  %447 = vrot.lane.b32.xlu1 %v701_v18, %s810_s30 }
  0x15   : > { %726 = vmatpush3.bf16.msra.mxu1 %v397_v26 }
  0x16   : > { %731 = vmatprep.subr.bf16.mxu1 %v808_v0 }
  0x18   : > { %442 = vrot.lane.b32.xlu1 %v700_v19, %s810_s30 }
  0x1a   : > { %722 = vmatmul.mubr.msk.bf16.vlgmr.msra.gmra.mxu0 %vm324_vm1, %v321_v3 }
  0x1b   : > { %739 = vmatprep.mubr.msk.bf16.mxu0 %vm809_vm0, %v808_v0 }
  0x86   : > { %v448_v29 = vpop.permute.xlu1 %447 }
  0x87   : > { %v453_v31 = vsel %vm324_vm1, %v448_v29, 0 }
  0x8a   : > { %v443_v33 = vpop.permute.xlu1 %442 }
  0xda   : > { %v365_v11 = vpop.f32.mrf.mxu0 }
  0xdb   : > { %v371_v12 = vmul.f32 0.125, %v365_v11 }
  0xdc   : > { %v723_v13 = vpop.f32.mrf.mxu0 }
  0xdd   : > { %v378_v14 = vadd.f32 %v376_v10, %v371_v12 }
  0xde   : > { %v368_v15 = vpop.f32.mrf.mxu0 }
  0xdf   : > { %v380_v16 = vsel %vm379_vm2, %v378_v14, -inf }
  0xe0   : > { %381 = vmax.xlane.f32.xlu0 %v380_v16  ;;  %v724_v17 = vpop.f32.mrf.mxu0 }
 0x169   : > { %v382_v20 = vpop.xlane.xlu0 %381 }
 0x16a   : > { %v383_v21 = vsub.f32 %v378_v14, %v382_v20 }
 0x16c   : > { %v384_v22 = vmul.f32 1.442695, %v383_v21 }
 0x16e   : > { %776 = vpow2.f32 %v384_v22 }
 0x17b   : > { %v777_v23 = vpop.eup %776 }
 0x17c   : > { %v386_v24 = vsel %vm379_vm2, %v777_v23, 0.0 }
 0x17d   : > { %387 = vadd.xlane.f32.xlu0 %v386_v24 }
 0x206   : > { %v388_v27 = vpop.xlane.xlu0 %387 }
 0x207   : > { %778 = vrcp.f32 %v388_v27 }
 0x214   : > { %v779_v28 = vpop.eup %778 }
 0x215   : > { %v390_v30 = vmul.f32 %v779_v28, %v777_v23 }
 0x217   : > { %v391_v32 = vpack.c.bf16 %v390_v30, %v390_v30 }
 0x219   : > { %728 = vmatmul.mubr.msk.bf16.vlgmr.msra.gmra.mxu1 %vm379_vm2, %v391_v32 }
 0x21a   : > { %732 = vmatpush3.bf16.xpose.msra.mxu1 %v453_v31  ;;  %733 = vmatprep.mubr.msk.bf16.mxu1 %vm809_vm0, %v808_v0 }
 0x221   : > { %734 = vmatmul.mubr.msk.bf16.vlgmr.msra.gmra.mxu1 %vm324_vm1, %v443_v33 }
 0x2d9   : > { %v433_v34 = vpop.f32.mrf.mxu1 }
 0x2db   : > { %v729_v35 = vpop.f32.mrf.mxu1 }
 0x2dd   : > { %v436_v36 = vpop.f32.mrf.mxu1 }
 0x2df   : > { %v730_v37 = vpop.f32.mrf.mxu1 }
 0x2e1   : > { %v489_v38 = vpop.f32.mrf.mxu1 }
 0x2e2   : > { %v495_v39 = vmul.f32 0.125, %v489_v38 }
 0x2e3   : > { %v735_v40 = vpop.f32.mrf.mxu1 }
 0x2e4   : > { %v496_v41 = vadd.f32 %v495_v39, %v376_v10 }
 0x2e5   : > { %v492_v42 = vpop.f32.mrf.mxu1 }
 0x2e6   : > { %v497_v43 = vsel %vm379_vm2, %v496_v41, -inf }
 0x2e7   : > { %498 = vmax.xlane.f32.xlu0 %v497_v43  ;;  %v736_v44 = vpop.f32.mrf.mxu1 }
 0x2fd   : > { %512 = vrot.lane.b32.xlu0 %v703_v45, %s810_s30 }
 0x370   : > { %v499_v46 = vpop.xlane.xlu0 %498 }
 0x371   : > { %v500_v47 = vsub.f32 %v496_v41, %v499_v46 }
 0x373   : > { %v501_v48 = vmul.f32 1.442695, %v500_v47 }
 0x374   : > { %v513_v51 = vpop.permute.xlu0 %512 }
 0x375   : > { %780 = vpow2.f32 %v501_v48  ;;  %v518_v52 = vsel %vm395_vm3, %v513_v51, 0 }
 0x376   : > { %738 = vmatpush3.bf16.msra.mxu0 %v518_v52 }
 0x382   : > { %v781_v49 = vpop.eup %780 }
 0x383   : > { %v503_v50 = vsel %vm379_vm2, %v781_v49, 0.0 }
 0x384   : > { %504 = vadd.xlane.f32.xlu1 %v503_v50 }
 0x40d   : > { %v505_v53 = vpop.xlane.xlu1 %504 }
 0x40e   : > { %782 = vrcp.f32 %v505_v53 }
 0x41b   : > { %v783_v54 = vpop.eup %782 }
 0x41c   : > { %v507_v55 = vmul.f32 %v783_v54, %v781_v49 }
 0x41e   : > { %v508_v56 = vpack.c.bf16 %v507_v55, %v507_v55 }
 0x420   : > { %740 = vmatmul.mubr.msk.bf16.vlgmr.msra.gmra.mxu0 %vm379_vm2, %v508_v56 }
 0x4e0   : > { %v554_v57 = vpop.f32.mrf.mxu0 }
 0x4e1   : > { %561 = vrot.lane.b32.xlu0 %v554_v57, %s810_s30 }
 0x4e2   : > { %v741_v58 = vpop.f32.mrf.mxu0 }
 0x4e4   : > { %v557_v59 = vpop.f32.mrf.mxu0 }
 0x4e6   : > { %v742_v60 = vpop.f32.mrf.mxu0 }
 0x553   : > { %v562_v61 = vpop.permute.xlu0 %561 }
 0x554   : > { %v564_v62 = vsel %vm324_vm1, %v433_v34, %v562_v61 }
 0x555   : > { %v565_v63 = vpack.c.bf16 %v564_v62, %v564_v62 }
 0x557   : > { %566 = vst [vmem:[%s316_s12] sm:$0xf] %v565_v63 }
 0x558 PF: > { %s14_s17 = sadd.s32 1, %s806_s17   ;;  %s922_s15 = smov %s802_s16 }
 0x559   : > { %p11_p5 = scmp.ge.s32.totalorder %s14_s17, 4   ;;  %s923_s16 = smov %s925_s18 }
 0x55b   :  { %13 = sbr.rel (!%p11_p5) target bundleno = 2 (0x2), region = 75 }

// kernel: sbert_forward.11
= control target key start
LH: loop header
LB: loop body
LE: loop exit
PB: predicated region body
PF: predicated region fallthrough
CT: control target
= control target key end

     0   :  { %v453_v0 = vmov 0.0   ;;  %vm454_vm0 = vmmov 0   ;;  %v455_v3 = vmov 0   ;;  %v306_v27 = vlaneseq  ;;  %s566_s1 = inlined_call_operand.vmem [shape: bf16[128,384], index: 1, kind: input, shape index: {}]   ;;  %s567_s0 = inlined_call_operand.vmem [shape: bf16[16,128], index: 0, kind: input, shape index: {}]   ;;  %s568_s2 = inlined_call_operand.vmem [shape: f32[1,384], index: 2, kind: input, shape index: {}]   ;;  %s569_s3 = inlined_call_operand.vmem [shape: bf16[16,384], index: 3, kind: output, shape index: {}]  }
   0x1   :  { %397 = vmatprep.subr.bf16.mxu1 %v453_v0  ;;  %v420_v1 = vld [vmem:[%s566_s1 + $0xac] ss:$12 sps:$4 sm:$0xff]   ;;  %413 = vmatprep.mubr.msk.bf16.mxu1 %vm454_vm0, %v453_v0  ;;  %v422_v2 = vld [vmem:[%s566_s1 + $0xb0] ss:$12 sps:$4 sm:$0xff]   ;;  %v423_v4 = vld [vmem:[%s566_s1 + $0xa8] ss:$12 sps:$4 sm:$0xff]  }
   0x2   :  { %231 = vmatprep.mubr.bf16.mxu0 %v455_v3  ;;  %199 = vmatprep.subr.bf16.mxu0 %v420_v1  ;;  %v424_v5 = vld [vmem:[%s566_s1 + $0x94] ss:$12 sps:$4 sm:$0xff]   ;;  %v426_v6 = vld [vmem:[%s566_s1 + $0x98] ss:$12 sps:$4 sm:$0xff]   ;;  %v427_v7 = vld [vmem:[%s566_s1 + $0x90] ss:$12 sps:$4 sm:$0xff]  }
   0x3   :  { %398 = vmatpush3.bf16.msra.mxu1 %v422_v2  ;;  %200 = vmatpush1.bf16.msra.mxu0 %v423_v4  ;;  %v428_v8 = vld [vmem:[%s566_s1 + $0x7c] ss:$12 sps:$4 sm:$0xff]   ;;  %v430_v9 = vld [vmem:[%s566_s1 + $0x80] ss:$12 sps:$4 sm:$0xff]   ;;  %v431_v10 = vld [vmem:[%s566_s1 + $0x78] ss:$12 sps:$4 sm:$0xff]  }
   0x4   :  { %399 = vmatprep.subr.bf16.mxu1 %v453_v0  ;;  %201 = vmatprep.subr.bf16.mxu0 %v424_v5  ;;  %v432_v11 = vld [vmem:[%s566_s1 + $0x64] ss:$12 sps:$4 sm:$0xff]   ;;  %v434_v12 = vld [vmem:[%s566_s1 + $0x68] ss:$12 sps:$4 sm:$0xff]   ;;  %v435_v13 = vld [vmem:[%s566_s1 + $0x60] ss:$12 sps:$4 sm:$0xff]  }
   0x5   :  { %v436_v14 = vld [vmem:[%s566_s1 + $0x4c] ss:$12 sps:$4 sm:$0xff]   ;;  %v438_v15 = vld [vmem:[%s566_s1 + $0x50] ss:$12 sps:$4 sm:$0xff]   ;;  %v439_v16 = vld [vmem:[%s566_s1 + $0x48] ss:$12 sps:$4 sm:$0xff]  }
   0x6   :  { %v440_v17 = vld [vmem:[%s566_s1 + $0x34] ss:$12 sps:$4 sm:$0xff]   ;;  %v442_v18 = vld [vmem:[%s566_s1 + $0x38] ss:$12 sps:$4 sm:$0xff]   ;;  %v443_v19 = vld [vmem:[%s566_s1 + $0x30] ss:$12 sps:$4 sm:$0xff]  }
   0x7   :  { %400 = vmatpush3.bf16.msra.mxu1 %v426_v6  ;;  %202 = vmatpush1.bf16.msra.mxu0 %v427_v7  ;;  %v444_v20 = vld [vmem:[%s566_s1 + $0x1c] ss:$12 sps:$4 sm:$0xff]   ;;  %v446_v21 = vld [vmem:[%s566_s1 + $0x20] ss:$12 sps:$4 sm:$0xff]   ;;  %v447_v22 = vld [vmem:[%s566_s1 + $0x18] ss:$12 sps:$4 sm:$0xff]  }
   0x8   :  { %401 = vmatprep.subr.bf16.mxu1 %v453_v0  ;;  %203 = vmatprep.subr.bf16.mxu0 %v428_v8  ;;  %v448_v23 = vld [vmem:[%s566_s1 + $0x4] ss:$12 sps:$4 sm:$0xff]   ;;  %v450_v24 = vld [vmem:[%s566_s1 + $0x8] ss:$12 sps:$4 sm:$0xff]   ;;  %v451_v25 = vld [vmem:[%s566_s1] ss:$12 sps:$4 sm:$0xff]  }
   0x9   :  { %v452_v26 = vld [vmem:[%s567_s0] sm:$0xff]   ;;  %v307_v28 = vshrl.u32 %v306_v27, 7 }
   0xa   :  { %v304_v30 = vld [vmem:[%s568_s2] sm:$0x7] }
   0xb   :  { %402 = vmatpush3.bf16.msra.mxu1 %v430_v9  ;;  %204 = vmatpush1.bf16.msra.mxu0 %v431_v10  ;;  %v316_v29 = vsub.s32 2, %v307_v28  ;;  %v308_v31 = vsub.s32 0, %v307_v28  ;;  %v312_v32 = vsub.s32 1, %v307_v28 }
   0xc   :  { %403 = vmatprep.subr.bf16.mxu1 %v453_v0  ;;  %205 = vmatprep.subr.bf16.mxu0 %v432_v11 }
   0xd   :  { %v317_v33 = vrot.slane %v304_v30, %v316_v29  ;;  %v309_v35 = vrot.slane %v304_v30, %v308_v31  ;;  %v313_v36 = vrot.slane %v304_v30, %v312_v32 }
   0xf   :  { %404 = vmatpush3.bf16.msra.mxu1 %v434_v12  ;;  %206 = vmatpush1.bf16.msra.mxu0 %v435_v13 }
  0x10   :  { %405 = vmatprep.subr.bf16.mxu1 %v453_v0  ;;  %207 = vmatprep.subr.bf16.mxu0 %v436_v14 }
  0x13   :  { %406 = vmatpush3.bf16.msra.mxu1 %v438_v15  ;;  %208 = vmatpush1.bf16.msra.mxu0 %v439_v16 }
  0x14   :  { %407 = vmatprep.subr.bf16.mxu1 %v453_v0  ;;  %209 = vmatprep.subr.bf16.mxu0 %v440_v17 }
  0x17   :  { %408 = vmatpush3.bf16.msra.mxu1 %v442_v18  ;;  %210 = vmatpush1.bf16.msra.mxu0 %v443_v19 }
  0x18   :  { %409 = vmatprep.subr.bf16.mxu1 %v453_v0  ;;  %211 = vmatprep.subr.bf16.mxu0 %v444_v20 }
  0x1b   :  { %410 = vmatpush3.bf16.msra.mxu1 %v446_v21  ;;  %212 = vmatpush1.bf16.msra.mxu0 %v447_v22 }
  0x1c   :  { %411 = vmatprep.subr.bf16.mxu1 %v453_v0  ;;  %213 = vmatprep.subr.bf16.mxu0 %v448_v23 }
  0x1f   :  { %412 = vmatpush3.bf16.msra.mxu1 %v450_v24  ;;  %214 = vmatpush1.bf16.msra.mxu0 %v451_v25 }
  0x22   :  { %414 = vmatmul.mubr.bf16.vlgmr.msra.gmra.mxu1 %v452_v26  ;;  %232 = vmatmul.mubr.bf16.vlgmr.msra.gmra.mxu0 %v452_v26 }
  0xe2   :  { %v276_v34 = vpop.f32.mrf.mxu1  ;;  %v233_v38 = vpop.f32.mrf.mxu0 }
  0xe3   :  { %v323_v37 = vadd.f32 %v317_v33, %v276_v34  ;;  %v321_v42 = vadd.f32 %v309_v35, %v233_v38 }
  0xe4   :  { %v415_v39 = vpop.f32.mrf.mxu1  ;;  %v235_v41 = vpop.f32.mrf.mxu0 }
  0xe5   :  { %v385_v40 = vpack.c.bf16 %v323_v37, %v323_v37  ;;  %v322_v43 = vadd.f32 %v313_v36, %v235_v41 }
  0xe6   :  { %v279_v44 = vpop.f32.mrf.mxu1  ;;  %v237_v46 = vpop.f32.mrf.mxu0 }
  0xe7   :  { %348 = vst [vmem:[%s569_s3 + $0x8] sm:$0xf] %v385_v40  ;;  %v326_v45 = vadd.f32 %v317_v33, %v279_v44  ;;  %v384_v47 = vpack.c.bf16 %v322_v43, %v321_v42  ;;  %v324_v51 = vadd.f32 %v309_v35, %v237_v46 }
  0xe8   :  { %v416_v48 = vpop.f32.mrf.mxu1  ;;  %v239_v50 = vpop.f32.mrf.mxu0 }
  0xe9   :  { %v387_v49 = vpack.c.bf16 %v326_v45, %v326_v45  ;;  %347 = vst [vmem:[%s569_s3] sm:$0xff] %v384_v47  ;;  %v325_v52 = vadd.f32 %v313_v36, %v239_v50 }
  0xeb   :  { %350 = vst [vmem:[%s569_s3 + $0x14] sm:$0xf] %v387_v49  ;;  %v386_v53 = vpack.c.bf16 %v325_v52, %v324_v51 }
  0xed   :  { %349 = vst [vmem:[%s569_s3 + $0xc] sm:$0xff] %v386_v53 }

// kernel: sbert_forward.21
= control target key start
LH: loop header
LB: loop body
LE: loop exit
PB: predicated region body
PF: predicated region fallthrough
CT: control target
= control target key end

     0   :  { %v260_v1 = vmov 0.0   ;;  %vm18_vm0 = vcmask 64512   ;;  %vm261_vm1 = vmmov 0   ;;  %s304_s0 = inlined_call_operand.vmem [shape: bf16[2,8,128], index: 0, kind: input, shape index: {}]   ;;  %s305_s1 = inlined_call_operand.vmem [shape: f32[2,1,8], index: 1, kind: input, shape index: {}]   ;;  %s306_s2 = inlined_call_operand.vmem [shape: f32[2,1,1], index: 2, kind: input, shape index: {}]   ;;  %s307_s3 = inlined_call_operand.hbm [shape: f32[2,1,128], index: 3, kind: output, shape index: {}]  }
   0x1   :  { %v16_v0 = vld [vmem:[%s304_s0] sm:$0xff]   ;;  %221 = vmatprep.subr.mxu0 %v260_v1  ;;  %226 = vmatprep.subr.mxu1 %v260_v1 }
   0x2   :  { %v17_v2 = vunpack.c.l.bf16 %v16_v0  ;;  %v108_v3 = vunpack.c.h.bf16 %v16_v0  ;;  %v15_v4 = vld [vmem:[%s305_s1] sm:$0x1]  ;;  %v213_v5 = vld [vmem:[%s305_s1 + $0x1] sm:$0x1]  ;;  %223 = vmatprep.mubr.msk.f32.mxu0 %vm261_vm1, %v260_v1  ;;  %228 = vmatprep.mubr.msk.f32.mxu1 %vm261_vm1, %v260_v1 }
   0x3   :  { %8 = vsyncpa [#allocation3], 0  ;;  %v92_v6 = vld [vmem:[%s306_s2] sm:$0x1]  ;;  %v262_v7 = vmov 0   ;;  %v98_v9 = vlaneseq  ;;  %s263_s1 = smov [#allocation2]  }
   0x4   :  { %222 = vmatpush3.msra.mxu0 %v17_v2  ;;  %227 = vmatpush3.msra.mxu1 %v108_v3  ;;  %v216_v8 = vld [vmem:[%s306_s2 + $0x1] sm:$0x1]  ;;  %s201_s21 = sshll.u32 %s263_s1, 4  ;;  %s202_s21 = int_to_ptr.vmem [resolvable:$true] %s201_s21 }
   0x5   :  { %224 = vmatmul.mubr.msk.f32.vlgmr.msra.gmra.mxu0 %vm18_vm0, %v15_v4  ;;  %229 = vmatmul.mubr.msk.f32.vlgmr.msra.gmra.mxu1 %vm18_vm0, %v213_v5  ;;  %v99_v11 = vshrl.u32 %v98_v9, 7  ;;  %s238_s2 = scalar_lea.vmem %s202_s21, 32  ;;  %p243_p1 = scmp.lt.s32.totalorder %s202_s21, %s202_s21 }
   0x6   :  { %237 = vset.pattern.permute.xlu0 %v262_v7  ;;  %p239_p0 = scmp.ne.s32.totalorder %s202_s21, %s238_s2  ;;  %p244_p2 = scmp.lt.s32.totalorder %s238_s2, %s238_s2 }
   0x7   :  { %95 = vperm.xlu0 %237, %v92_v6   ;;  %v100_v12 = vsub.s32 0, %v99_v11 }
   0x8   :  { %p245_p3 = por %p244_p2, %p243_p1 }
   0xa   :  { %p246_p4 = pnand %p245_p3, %p239_p0 }
   0xb   :  { %186 = vperm.xlu0 %237, %v216_v8  }
  0x82   :  { %v96_v10 = vpop.permute.xlu0 %95 }
  0x83   :  { %v101_v14 = vrot.slane %v96_v10, %v100_v12 }
  0x86   :  { %v187_v13 = vpop.permute.xlu0 %186 }
  0x87   :  { %v192_v15 = vrot.slane %v187_v13, %v100_v12 }
  0xc5   :  { %v88_v16 = vpop.f32.mrf.mxu0  ;;  %v178_v17 = vpop.f32.mrf.mxu1 }
  0xc6   :  { %v102_v18 = vmul.f32 %v101_v14, %v88_v16  ;;  %v193_v19 = vmul.f32 %v192_v15, %v178_v17 }
  0xc7   :  { %v225_v20 = vpop.f32.mrf.mxu0  ;;  %v230_v21 = vpop.f32.mrf.mxu1 }
  0xc8   :  { %103 = vst [vmem:[#allocation2] sm:$0x1] %v102_v18  ;;  %195 = vst [vmem:[#allocation2 + $0x1] sm:$0x1] %v193_v19 }
  0xc9   :  { %249 = shalt.err (!%p246_p4)
}
  0xca   :  { %s264_s22 = smov 16   ;;  %s265_s23 = smov 1  }
  0xcb   :  { %207 = dma.vmem_to_hbm [thread:$0]  %s202_s21, 32, %s307_s3, [#allocation3], %s264_s22, %s264_s22, %s265_s23  }
  0xcc   :  { %258 = dma.done.wait [#allocation3], 32  }
  0xcd   :  { %259 = vsyncadd [#allocation3], 4294967264 }
  0xce   :  { %211 = vsyncpa [#allocation3], 1 }

// kernel: sbert_forward.15
= control target key start
LH: loop header
LB: loop body
LE: loop exit
PB: predicated region body
PF: predicated region fallthrough
CT: control target
= control target key end

     0   :  { %s475_s1 = inlined_call_operand.vmem [shape: bf16[256,128], index: 1, kind: input, shape index: {}]   ;;  %s476_s0 = inlined_call_operand.vmem [shape: bf16[16,256], index: 0, kind: input, shape index: {}]   ;;  %s477_s3 = inlined_call_operand.vmem [shape: bf16[16,128], index: 3, kind: input, shape index: {}]   ;;  %s478_s2 = inlined_call_operand.vmem [shape: f32[1,128], index: 2, kind: input, shape index: {}]   ;;  %s479_s4 = inlined_call_operand.vmem [shape: f32[1,128], index: 4, kind: input, shape index: {}]   ;;  %s480_s5 = inlined_call_operand.vmem [shape: f32[1,128], index: 5, kind: input, shape index: {}]   ;;  %s481_s6 = inlined_call_operand.vmem [shape: bf16[16,128], index: 6, kind: output, shape index: {}]  }
   0x1   :  { %v348_v0 = vld [vmem:[%s475_s1 + $0x78] sm:$0xff]   ;;  %v350_v2 = vld [vmem:[%s475_s1 + $0x70] sm:$0xff]   ;;  %v352_v4 = vld [vmem:[%s475_s1 + $0x68] sm:$0xff]  }
   0x2   :  { %v349_v1 = vld [vmem:[%s475_s1 + $0x38] sm:$0xff]   ;;  %326 = vmatprep.subr.bf16.mxu0 %v348_v0  ;;  %v351_v3 = vld [vmem:[%s475_s1 + $0x30] sm:$0xff]   ;;  %v353_v5 = vld [vmem:[%s475_s1 + $0x28] sm:$0xff]  }
   0x3   :  { %327 = vmatpush3.bf16.msra.mxu0 %v349_v1  ;;  %v354_v6 = vld [vmem:[%s475_s1 + $0x60] sm:$0xff]   ;;  %v356_v8 = vld [vmem:[%s475_s1 + $0x58] sm:$0xff]   ;;  %v358_v10 = vld [vmem:[%s475_s1 + $0x50] sm:$0xff]  }
   0x4   :  { %328 = vmatprep.subr.bf16.mxu0 %v350_v2  ;;  %v355_v7 = vld [vmem:[%s475_s1 + $0x20] sm:$0xff]   ;;  %v357_v9 = vld [vmem:[%s475_s1 + $0x18] sm:$0xff]   ;;  %v359_v12 = vld [vmem:[%s475_s1 + $0x10] sm:$0xff]  }
   0x5   :  { %v366_v11 = vld [vmem:[%s476_s0 + $0x4] ss:$8 sps:$4 sm:$0xff]   ;;  %v364_v17 = vld [vmem:[%s476_s0] ss:$8 sps:$4 sm:$0xff]  }
   0x6   :  { %204 = vmatprep.mubr.bf16.mxu0 %v366_v11  ;;  %v360_v13 = vld [vmem:[%s475_s1 + $0x48] sm:$0xff]   ;;  %v362_v15 = vld [vmem:[%s475_s1 + $0x40] sm:$0xff]  }
   0x7   :  { %329 = vmatpush3.bf16.msra.mxu0 %v351_v3  ;;  %v361_v14 = vld [vmem:[%s475_s1 + $0x8] sm:$0xff]   ;;  %v363_v16 = vld [vmem:[%s475_s1] sm:$0xff]  }
   0x8   :  { %330 = vmatprep.subr.bf16.mxu0 %v352_v4  ;;  %v318_v19 = vld [vmem:[%s477_s3] sm:$0xff]  }
   0x9   :  { %v310_v21 = vld [vmem:[%s478_s2] ss:$0 sm:$0xff]  ;;  %v319_v23 = vunpack.c.l.bf16 %v318_v19  ;;  %v320_v29 = vunpack.c.h.bf16 %v318_v19 }
   0xa   :  { %v311_v48 = vld [vmem:[%s479_s4] ss:$0 sm:$0xff] }
   0xb   :  { %331 = vmatpush3.bf16.msra.mxu0 %v353_v5  ;;  %v312_v52 = vld [vmem:[%s480_s5] ss:$0 sm:$0xff] }
   0xc   :  { %332 = vmatprep.subr.bf16.mxu0 %v354_v6 }
   0xf   :  { %333 = vmatpush3.bf16.msra.mxu0 %v355_v7 }
  0x10   :  { %334 = vmatprep.subr.bf16.mxu0 %v356_v8 }
  0x13   :  { %335 = vmatpush3.bf16.msra.mxu0 %v357_v9 }
  0x14   :  { %336 = vmatprep.subr.bf16.mxu0 %v358_v10 }
  0x17   :  { %337 = vmatpush3.bf16.msra.mxu0 %v359_v12 }
  0x18   :  { %338 = vmatprep.subr.bf16.mxu0 %v360_v13 }
  0x1b   :  { %339 = vmatpush3.bf16.msra.mxu0 %v361_v14 }
  0x1c   :  { %340 = vmatprep.subr.bf16.mxu0 %v362_v15 }
  0x1f   :  { %341 = vmatpush3.bf16.msra.mxu0 %v363_v16 }
  0x22   :  { %205 = vmatmul.mubr.bf16.vlgmr.msra.gmra.mxu0 %v364_v17 }
  0xe2   :  { %v342_v18 = vpop.f32.mrf.mxu0 }
  0xe4   :  { %v343_v20 = vpop.f32.mrf.mxu0 }
  0xe5   :  { %v344_v22 = vadd.f32 %v343_v20, %v342_v18 }
  0xe6   :  { %v345_v24 = vpop.f32.mrf.mxu0 }
  0xe7   :  { %v229_v25 = vadd.f32 %v344_v22, %v310_v21 }
  0xe8   :  { %v346_v26 = vpop.f32.mrf.mxu0 }
  0xe9   :  { %v347_v27 = vadd.f32 %v346_v26, %v345_v24  ;;  %v235_v28 = vadd.f32 %v319_v23, %v229_v25 }
  0xeb   :  { %v230_v30 = vadd.f32 %v347_v27, %v310_v21  ;;  %237 = vadd.xlane.f32.xlu0 %v235_v28 }
  0xed   :  { %v236_v31 = vadd.f32 %v320_v29, %v230_v30 }
  0xef   :  { %239 = vadd.xlane.f32.xlu0 %v236_v31 }
 0x174   :  { %v238_v32 = vpop.xlane.xlu0 %237 }
 0x175   :  { %v242_v33 = vmul.f32 0.0078125, %v238_v32 }
 0x177   :  { %v244_v34 = vsub.f32 %v235_v28, %v242_v33 }
 0x178   :  { %v240_v35 = vpop.xlane.xlu0 %239 }
 0x179   :  { %v243_v36 = vmul.f32 0.0078125, %v240_v35  ;;  %v246_v37 = vmul.f32 %v244_v34, %v244_v34 }
 0x17b   :  { %v245_v38 = vsub.f32 %v236_v31, %v243_v36  ;;  %248 = vadd.xlane.f32.xlu1 %v246_v37 }
 0x17d   :  { %v247_v39 = vmul.f32 %v245_v38, %v245_v38 }
 0x17f   :  { %250 = vadd.xlane.f32.xlu1 %v247_v39 }
 0x204   :  { %v249_v40 = vpop.xlane.xlu1 %248 }
 0x205   :  { %v252_v41 = vmul.f32 0.0078125, %v249_v40 }
 0x207   :  { %v254_v42 = vadd.f32 1e-12, %v252_v41 }
 0x208   :  { %v251_v43 = vpop.xlane.xlu1 %250 }
 0x209   :  { %367 = vrsqrt.f32 %v254_v42  ;;  %v253_v44 = vmul.f32 0.0078125, %v251_v43 }
 0x20b   :  { %v255_v45 = vadd.f32 1e-12, %v253_v44 }
 0x20d   :  { %369 = vrsqrt.f32 %v255_v45 }
 0x216   :  { %v368_v46 = vpop.eup %367 }
 0x217   :  { %v258_v47 = vmul.f32 %v368_v46, %v244_v34 }
 0x219   :  { %v267_v50 = vmul.f32 %v311_v48, %v258_v47 }
 0x21a   :  { %v370_v49 = vpop.eup %369 }
 0x21b   :  { %v259_v51 = vmul.f32 %v370_v49, %v245_v38  ;;  %v276_v54 = vadd.f32 %v312_v52, %v267_v50 }
 0x21d   :  { %v268_v53 = vmul.f32 %v311_v48, %v259_v51 }
 0x21f   :  { %v277_v55 = vadd.f32 %v312_v52, %v268_v53 }
 0x221   :  { %v324_v56 = vpack.c.bf16 %v277_v55, %v276_v54 }
 0x223   :  { %325 = vst [vmem:[%s481_s6] sm:$0xff] %v324_v56  }

</bundles_post_ra>
